<compile_context>
chip_gen: v7x
topology: tpu7x:2x2x1
jax: 0.10.0
libtpu: 0.0.40
codegen_flags: <defaults>
</compile_context>

<pallas_src>
import functools

import jax
import jax.numpy as jnp
from jax.experimental import pallas as pl
from jax.experimental.pallas import tpu as pltpu

IN_DIM, H1, H2, OUT_DIM = 100, 256, 512, 28 * 28
IN_PAD, OUT_PAD = 128, 896          # ragged dims padded to multiples of 128 lanes
TILE_B = 128                        # batch tile: multiple of 128 (MXU M rows)


def _generator_kernel(x_ref, w1_ref, b1_ref, w2_ref, b2_ref, w3_ref, b3_ref, out_ref):
    # Matmuls in bf16 on the MXU with f32 accumulation; bias/ReLU/tanh in f32.
    x = x_ref[...]                                                         # (TILE_B, 128) bf16
    h1 = jnp.dot(x, w1_ref[...], preferred_element_type=jnp.float32) + b1_ref[...]
    h1 = jnp.maximum(h1, 0.0).astype(jnp.bfloat16)                         # (TILE_B, 256)
    h2 = jnp.dot(h1, w2_ref[...], preferred_element_type=jnp.float32) + b2_ref[...]
    h2 = jnp.maximum(h2, 0.0).astype(jnp.bfloat16)                         # (TILE_B, 512)
    h3 = jnp.dot(h2, w3_ref[...], preferred_element_type=jnp.float32) + b3_ref[...]
    out_ref[...] = jnp.tanh(h3)                                            # (TILE_B, 896) f32


def _prepare_kernel_params(params_f32):
    """Pad ragged feature dims to multiples of 128 and cast matmul operands to bf16."""
    w1, b1, w2, b2, w3, b3 = params_f32
    w1p = jnp.zeros((IN_PAD, H1), jnp.bfloat16).at[:IN_DIM, :].set(w1.astype(jnp.bfloat16))
    w3p = jnp.zeros((H2, OUT_PAD), jnp.bfloat16).at[:, :OUT_DIM].set(w3.astype(jnp.bfloat16))
    b3p = jnp.zeros((1, OUT_PAD), jnp.float32).at[:, :OUT_DIM].set(b3.astype(jnp.float32))
    return (w1p, b1.astype(jnp.float32),
            w2.astype(jnp.bfloat16), b2.astype(jnp.float32),
            w3p, b3p)


@functools.partial(jax.jit, static_argnames=("tile_b",))
def generator_forward(x, params_f32, *, tile_b=TILE_B):
    """x: (B, 100) float32 noise.  Returns (B, 28, 28, 1) float32 image."""
    w1p, b1, w2p, b2, w3p, b3p = _prepare_kernel_params(params_f32)
    B = x.shape[0]
    n_tiles = pl.cdiv(B, tile_b)
    b_pad = n_tiles * tile_b

    # Zero-pad batch to a tile multiple and features 100 -> 128
    # (the padded K columns hit zero rows of w1, so the result is exact).
    x_p = jnp.zeros((b_pad, IN_PAD), jnp.bfloat16)
    x_p = x_p.at[:B, :IN_DIM].set(x.astype(jnp.bfloat16))

    weight_bytes = (IN_PAD * H1 + H1 * H2 + H2 * OUT_PAD) * 2 + (H1 + H2 + OUT_PAD) * 4
    cost = pl.CostEstimate(
        flops=2 * b_pad * (IN_PAD * H1 + H1 * H2 + H2 * OUT_PAD),
        transcendentals=b_pad * OUT_PAD,
        bytes_accessed=weight_bytes + x_p.size * 2 + b_pad * OUT_PAD * 4,
    )

    out_flat = pl.pallas_call(
        _generator_kernel,
        out_shape=jax.ShapeDtypeStruct((b_pad, OUT_PAD), jnp.float32),
        grid_spec=pltpu.PrefetchScalarGridSpec(
            num_scalar_prefetch=0,
            grid=(n_tiles,),
            in_specs=[
                pl.BlockSpec((tile_b, IN_PAD), lambda i: (i, 0)),   # x tile (pipelined)
                pl.BlockSpec((IN_PAD, H1), lambda i: (0, 0)),       # weights/biases:
                pl.BlockSpec((1, H1), lambda i: (0, 0)),            #   constant block index
                pl.BlockSpec((H1, H2), lambda i: (0, 0)),           #   -> VMEM-resident
                pl.BlockSpec((1, H2), lambda i: (0, 0)),            #   across grid steps
                pl.BlockSpec((H2, OUT_PAD), lambda i: (0, 0)),
                pl.BlockSpec((1, OUT_PAD), lambda i: (0, 0)),
            ],
            out_specs=pl.BlockSpec((tile_b, OUT_PAD), lambda i: (i, 0)),
        ),
        compiler_params=pltpu.CompilerParams(
            dimension_semantics=("parallel",),      # shard batch tiles across TCs (v7x)
            vmem_limit_bytes=32 * 1024 * 1024,      # fits comfortably, safe on v7x 64 MiB
        ),
        cost_estimate=cost,
    )(x_p, w1p, b1, w2p, b2, w3p, b3p)

    # Drop batch / lane padding, then PyTorch-style view(-1, 28, 28, 1).
    return out_flat[:B, :OUT_DIM].reshape(-1, 28, 28, 1)


def init_params(key):
    """f32 params matching nn.Linear default init. Weights stored as (in, out) = weight.T."""
    dims = [(IN_DIM, H1), (H1, H2), (H2, OUT_DIM)]
    params = []
    for fan_in, fan_out in dims:
        kw, kb, key = jax.random.split(key, 3)
        bound = 1.0 / jnp.sqrt(fan_in)
        w = jax.random.uniform(kw, (fan_in, fan_out), jnp.float32, -bound, bound)
        b = jax.random.uniform(kb, (1, fan_out), jnp.float32, -bound, bound)
        params += [w, b]
    return tuple(params)


def generator_reference(x, params_f32):
    """Pure-JAX f32 reference (PyTorch semantics) for correctness checking."""
    w1, b1, w2, b2, w3, b3 = params_f32
    h1 = jnp.maximum(x @ w1 + b1, 0.0)
    h2 = jnp.maximum(h1 @ w2 + b2, 0.0)
    return jnp.tanh(h2 @ w3 + b3).reshape(-1, 28, 28, 1)


if __name__ == "__main__":
    key = jax.random.PRNGKey(0)
    k_noise, k_params = jax.random.split(key)

    params = init_params(k_params)
    batch = 8
    x = jax.random.normal(k_noise, (batch, IN_DIM), jnp.float32)   # noise vectors

    image = generator_forward(x, params)
    image = jax.block_until_ready(image)

    assert image.shape == (batch, 28, 28, 1), image.shape
    assert image.dtype == jnp.float32
    assert bool(jnp.all(jnp.abs(image) <= 1.0))   # tanh output range

    ref = generator_reference(x, params)
    max_err = float(jnp.max(jnp.abs(image - ref)))
    assert max_err < 3e-2, f"max abs error vs f32 reference: {max_err}"

    print("KERNEL_OK")
</pallas_src>

<mosaic_0001>
module attributes {stable_mosaic.version = 11 : i64} {
  func.func @_generator_kernel(%arg0: i32, %arg1: memref<128x128xbf16, #tpu.memory_space<vmem>>, %arg2: memref<128x256xbf16, #tpu.memory_space<vmem>>, %arg3: memref<1x256xf32, #tpu.memory_space<vmem>>, %arg4: memref<256x512xbf16, #tpu.memory_space<vmem>>, %arg5: memref<1x512xf32, #tpu.memory_space<vmem>>, %arg6: memref<512x896xbf16, #tpu.memory_space<vmem>>, %arg7: memref<1x896xf32, #tpu.memory_space<vmem>>, %arg8: memref<128x896xf32, #tpu.memory_space<vmem>>) attributes {dimension_semantics = [#tpu.dimension_semantics<parallel>], iteration_bounds = array<i64: 1>, scalar_prefetch = 0 : i64, scratch_operands = 0 : i64, tpu.core_type = #tpu.core_type<tc>, window_params = [{transform_indices = @transform_0, window_bounds = array<i64: 128, 128>}, {pipeline_mode = #tpu.pipeline_mode<synchronous>, transform_indices = @transform_1, window_bounds = array<i64: 128, 256>}, {pipeline_mode = #tpu.pipeline_mode<synchronous>, transform_indices = @transform_2, window_bounds = array<i64: 1, 256>}, {pipeline_mode = #tpu.pipeline_mode<synchronous>, transform_indices = @transform_3, window_bounds = array<i64: 256, 512>}, {pipeline_mode = #tpu.pipeline_mode<synchronous>, transform_indices = @transform_4, window_bounds = array<i64: 1, 512>}, {pipeline_mode = #tpu.pipeline_mode<synchronous>, transform_indices = @transform_5, window_bounds = array<i64: 512, 896>}, {pipeline_mode = #tpu.pipeline_mode<synchronous>, transform_indices = @transform_6, window_bounds = array<i64: 1, 896>}, {transform_indices = @transform_7, window_bounds = array<i64: 128, 896>}]} {
    %c0 = arith.constant 0 : index
    %c0_0 = arith.constant 0 : index
    %0 = vector.load %arg1[%c0, %c0_0] : memref<128x128xbf16, #tpu.memory_space<vmem>>, vector<128x128xbf16>
    %c0_1 = arith.constant 0 : index
    %c0_2 = arith.constant 0 : index
    %1 = vector.load %arg2[%c0_1, %c0_2] : memref<128x256xbf16, #tpu.memory_space<vmem>>, vector<128x256xbf16>
    %cst = arith.constant dense<0.000000e+00> : vector<128x256xf32>
    %2 = tpu.matmul %0, %1, %cst {dimension_numbers = #tpu.dot_dimension_numbers<[1], [0], [0], [1], [0, 0, 1, 1], [], []>} : vector<128x128xbf16>, vector<128x256xbf16>, vector<128x256xf32> -> vector<128x256xf32>
    %c0_3 = arith.constant 0 : index
    %c0_4 = arith.constant 0 : index
    %3 = vector.load %arg3[%c0_3, %c0_4] : memref<1x256xf32, #tpu.memory_space<vmem>>, vector<1x256xf32>
    %4 = vector.broadcast %3 : vector<1x256xf32> to vector<128x256xf32>
    %5 = arith.addf %2, %4 : vector<128x256xf32>
    %cst_5 = arith.constant 0.000000e+00 : f32
    %6 = vector.broadcast %cst_5 : f32 to vector<128x256xf32>
    %7 = arith.maximumf %5, %6 : vector<128x256xf32>
    %8 = arith.truncf %7 : vector<128x256xf32> to vector<128x256xbf16>
    %c0_6 = arith.constant 0 : index
    %c0_7 = arith.constant 0 : index
    %9 = vector.load %arg4[%c0_6, %c0_7] : memref<256x512xbf16, #tpu.memory_space<vmem>>, vector<256x512xbf16>
    %cst_8 = arith.constant dense<0.000000e+00> : vector<128x512xf32>
    %10 = tpu.matmul %8, %9, %cst_8 {dimension_numbers = #tpu.dot_dimension_numbers<[1], [0], [0], [1], [0, 0, 1, 1], [], []>} : vector<128x256xbf16>, vector<256x512xbf16>, vector<128x512xf32> -> vector<128x512xf32>
    %c0_9 = arith.constant 0 : index
    %c0_10 = arith.constant 0 : index
    %11 = vector.load %arg5[%c0_9, %c0_10] : memref<1x512xf32, #tpu.memory_space<vmem>>, vector<1x512xf32>
    %12 = vector.broadcast %11 : vector<1x512xf32> to vector<128x512xf32>
    %13 = arith.addf %10, %12 : vector<128x512xf32>
    %cst_11 = arith.constant 0.000000e+00 : f32
    %14 = vector.broadcast %cst_11 : f32 to vector<128x512xf32>
    %15 = arith.maximumf %13, %14 : vector<128x512xf32>
    %16 = arith.truncf %15 : vector<128x512xf32> to vector<128x512xbf16>
    %c0_12 = arith.constant 0 : index
    %c0_13 = arith.constant 0 : index
    %17 = vector.load %arg6[%c0_12, %c0_13] : memref<512x896xbf16, #tpu.memory_space<vmem>>, vector<512x896xbf16>
    %cst_14 = arith.constant dense<0.000000e+00> : vector<128x896xf32>
    %18 = tpu.matmul %16, %17, %cst_14 {dimension_numbers = #tpu.dot_dimension_numbers<[1], [0], [0], [1], [0, 0, 1, 1], [], []>} : vector<128x512xbf16>, vector<512x896xbf16>, vector<128x896xf32> -> vector<128x896xf32>
    %c0_15 = arith.constant 0 : index
    %c0_16 = arith.constant 0 : index
    %19 = vector.load %arg7[%c0_15, %c0_16] : memref<1x896xf32, #tpu.memory_space<vmem>>, vector<1x896xf32>
    %20 = vector.broadcast %19 : vector<1x896xf32> to vector<128x896xf32>
    %21 = arith.addf %18, %20 : vector<128x896xf32>
    %22 = math.tanh %21 : vector<128x896xf32>
    %c0_17 = arith.constant 0 : index
    %c0_18 = arith.constant 0 : index
    %23 = vector.load %arg8[%c0_17, %c0_18] : memref<128x896xf32, #tpu.memory_space<vmem>>, vector<128x896xf32>
    tpu.vector_store %arg8[%c0_17, %c0_18], %22 {strides = array<i32>} : memref<128x896xf32, #tpu.memory_space<vmem>>, vector<128x896xf32>,
    return
  }
  func.func @transform_0(%arg0: i32) -> (i32, i32) {
    %c0_i32 = arith.constant 0 : i32
    %c0_i32_0 = arith.constant 0 : i32
    return %arg0, %c0_i32 : i32, i32
  }
  func.func @transform_1(%arg0: i32) -> (i32, i32) {
    %c0_i32 = arith.constant 0 : i32
    %c0_i32_0 = arith.constant 0 : i32
    %c0_i32_1 = arith.constant 0 : i32
    return %c0_i32, %c0_i32_0 : i32, i32
  }
  func.func @transform_2(%arg0: i32) -> (i32, i32) {
    %c0_i32 = arith.constant 0 : i32
    %c0_i32_0 = arith.constant 0 : i32
    %c0_i32_1 = arith.constant 0 : i32
    return %c0_i32, %c0_i32_0 : i32, i32
  }
  func.func @transform_3(%arg0: i32) -> (i32, i32) {
    %c0_i32 = arith.constant 0 : i32
    %c0_i32_0 = arith.constant 0 : i32
    %c0_i32_1 = arith.constant 0 : i32
    return %c0_i32, %c0_i32_0 : i32, i32
  }
  func.func @transform_4(%arg0: i32) -> (i32, i32) {
    %c0_i32 = arith.constant 0 : i32
    %c0_i32_0 = arith.constant 0 : i32
    %c0_i32_1 = arith.constant 0 : i32
    return %c0_i32, %c0_i32_0 : i32, i32
  }
  func.func @transform_5(%arg0: i32) -> (i32, i32) {
    %c0_i32 = arith.constant 0 : i32
    %c0_i32_0 = arith.constant 0 : i32
    %c0_i32_1 = arith.constant 0 : i32
    return %c0_i32, %c0_i32_0 : i32, i32
  }
  func.func @transform_6(%arg0: i32) -> (i32, i32) {
    %c0_i32 = arith.constant 0 : i32
    %c0_i32_0 = arith.constant 0 : i32
    %c0_i32_1 = arith.constant 0 : i32
    return %c0_i32, %c0_i32_0 : i32, i32
  }
  func.func @transform_7(%arg0: i32) -> (i32, i32) {
    %c0_i32 = arith.constant 0 : i32
    %c0_i32_0 = arith.constant 0 : i32
    return %arg0, %c0_i32 : i32, i32
  }
}

</mosaic_0001>

<bundles_post_ra>
// kernel: generator_forward.1
= control target key start
LH: loop header
LB: loop body
LE: loop exit
PB: predicated region body
PF: predicated region fallthrough
CT: control target
= control target key end

     0   :  { %v4954_v1 = vmov 0   ;;  %s6843_s1 = inlined_call_operand.vmem [shape: bf16[128,256], index: 1, kind: input, shape index: {}]   ;;  %s6844_s0 = inlined_call_operand.vmem [shape: bf16[128,128], index: 0, kind: input, shape index: {}]   ;;  %s6845_s3 = inlined_call_operand.vmem [shape: bf16[256,512], index: 3, kind: input, shape index: {}]   ;;  %s6846_s5 = inlined_call_operand.vmem [shape: bf16[512,896], index: 5, kind: input, shape index: {}]   ;;  %s6847_s2 = inlined_call_operand.vmem [shape: f32[1,256], index: 2, kind: input, shape index: {}]   ;;  %s6848_s4 = inlined_call_operand.vmem [shape: f32[1,512], index: 4, kind: input, shape index: {}]   ;;  %s6849_s6 = inlined_call_operand.vmem [shape: f32[1,896], index: 6, kind: input, shape index: {}]   ;;  %s6850_s7 = inlined_call_operand.vmem [shape: f32[128,896], index: 7, kind: output, shape index: {}]  }
   0x1   :  { %v4282_v0 = vld [vmem:[%s6843_s1 + $0x4] ss:$8 sps:$4 sm:$0xff]   ;;  %231 = vmatprep.mubr.bf16.mxu0 %v4954_v1  ;;  %v4284_v2 = vld [vmem:[%s6843_s1] ss:$8 sps:$4 sm:$0xff]   ;;  %v4285_v3 = vld [vmem:[%s6843_s1 + $0x14] ss:$8 sps:$4 sm:$0xff]  }
   0x2   :  { %199 = vmatprep.subr.bf16.mxu0 %v4282_v0  ;;  %v4287_v4 = vld [vmem:[%s6843_s1 + $0x10] ss:$8 sps:$4 sm:$0xff]   ;;  %v4288_v5 = vld [vmem:[%s6843_s1 + $0x24] ss:$8 sps:$4 sm:$0xff]   ;;  %v4290_v6 = vld [vmem:[%s6843_s1 + $0x20] ss:$8 sps:$4 sm:$0xff]  }
   0x3   :  { %200 = vmatpush1.bf16.msra.mxu0 %v4284_v2  ;;  %v4291_v7 = vld [vmem:[%s6843_s1 + $0x34] ss:$8 sps:$4 sm:$0xff]   ;;  %v4293_v8 = vld [vmem:[%s6843_s1 + $0x30] ss:$8 sps:$4 sm:$0xff]   ;;  %v4294_v9 = vld [vmem:[%s6843_s1 + $0x44] ss:$8 sps:$4 sm:$0xff]  }
   0x4   :  { %201 = vmatprep.subr.bf16.mxu0 %v4285_v3  ;;  %v4296_v10 = vld [vmem:[%s6843_s1 + $0x40] ss:$8 sps:$4 sm:$0xff]   ;;  %v4297_v11 = vld [vmem:[%s6843_s1 + $0x54] ss:$8 sps:$4 sm:$0xff]   ;;  %v4299_v12 = vld [vmem:[%s6843_s1 + $0x50] ss:$8 sps:$4 sm:$0xff]  }
   0x5   :  { %v4314_v13 = vld [vmem:[%s6845_s3 + $0x4] ss:$16 sps:$4 sm:$0xff]   ;;  %v4319_v15 = vld [vmem:[%s6845_s3] ss:$16 sps:$4 sm:$0xff]   ;;  %v4318_v23 = vld [vmem:[%s6845_s3 + $0xc] ss:$16 sps:$4 sm:$0xff]  }
   0x6   :  { %v4300_v14 = vld [vmem:[%s6843_s1 + $0x64] ss:$8 sps:$4 sm:$0xff]   ;;  %766 = vmatprep.subr.bf16.mxu1 %v4314_v13  ;;  %v4302_v17 = vld [vmem:[%s6843_s1 + $0x60] ss:$8 sps:$4 sm:$0xff]   ;;  %v4303_v18 = vld [vmem:[%s6843_s1 + $0x74] ss:$8 sps:$4 sm:$0xff]  }
   0x7   :  { %202 = vmatpush1.bf16.msra.mxu0 %v4287_v4  ;;  %v4320_v16 = vld [vmem:[%s6845_s3 + $0x24] ss:$16 sps:$4 sm:$0xff]   ;;  %767 = vmatpush1.bf16.msra.mxu1 %v4319_v15  ;;  %v4325_v19 = vld [vmem:[%s6845_s3 + $0x20] ss:$16 sps:$4 sm:$0xff]   ;;  %v4316_v26 = vld [vmem:[%s6845_s3 + $0x8] ss:$16 sps:$4 sm:$0xff]  }
   0x8   :  { %203 = vmatprep.subr.bf16.mxu0 %v4288_v5  ;;  %768 = vmatprep.subr.bf16.mxu1 %v4320_v16  ;;  %v4326_v20 = vld [vmem:[%s6845_s3 + $0x44] ss:$16 sps:$4 sm:$0xff]   ;;  %v4305_v21 = vld [vmem:[%s6843_s1 + $0x70] ss:$8 sps:$4 sm:$0xff]   ;;  %v4324_v27 = vld [vmem:[%s6845_s3 + $0x2c] ss:$16 sps:$4 sm:$0xff]  }
   0x9   :  { %v4331_v22 = vld [vmem:[%s6845_s3 + $0x40] ss:$16 sps:$4 sm:$0xff]   ;;  %v4332_v24 = vld [vmem:[%s6845_s3 + $0x64] ss:$16 sps:$4 sm:$0xff]   ;;  %v4322_v30 = vld [vmem:[%s6845_s3 + $0x28] ss:$16 sps:$4 sm:$0xff]  }
   0xa   :  { %v4306_v25 = vld [vmem:[%s6844_s0] sm:$0xff]   ;;  %v4330_v31 = vld [vmem:[%s6845_s3 + $0x4c] ss:$16 sps:$4 sm:$0xff]   ;;  %v4328_v35 = vld [vmem:[%s6845_s3 + $0x48] ss:$16 sps:$4 sm:$0xff]  }
   0xb   :  { %204 = vmatpush1.bf16.msra.mxu0 %v4290_v6  ;;  %769 = vmatpush1.bf16.msra.mxu1 %v4325_v19  ;;  %v4337_v28 = vld [vmem:[%s6845_s3 + $0x60] ss:$16 sps:$4 sm:$0xff]   ;;  %v4338_v29 = vld [vmem:[%s6845_s3 + $0x84] ss:$16 sps:$4 sm:$0xff]   ;;  %v4307_v34 = vld [vmem:[%s6844_s0 + $0x8] sm:$0xff]  }
   0xc   :  { %205 = vmatprep.subr.bf16.mxu0 %v4291_v7  ;;  %770 = vmatprep.subr.bf16.mxu1 %v4326_v20  ;;  %v4343_v32 = vld [vmem:[%s6845_s3 + $0x80] ss:$16 sps:$4 sm:$0xff]   ;;  %v4344_v33 = vld [vmem:[%s6845_s3 + $0xa4] ss:$16 sps:$4 sm:$0xff]   ;;  %v4336_v36 = vld [vmem:[%s6845_s3 + $0x6c] ss:$16 sps:$4 sm:$0xff]  }
   0xd   :  { %v4349_v37 = vld [vmem:[%s6845_s3 + $0xa0] ss:$16 sps:$4 sm:$0xff]   ;;  %v4350_v38 = vld [vmem:[%s6845_s3 + $0xc4] ss:$16 sps:$4 sm:$0xff]   ;;  %v4334_v39 = vld [vmem:[%s6845_s3 + $0x68] ss:$16 sps:$4 sm:$0xff]  }
   0xe   :  { %v4342_v40 = vld [vmem:[%s6845_s3 + $0x8c] ss:$16 sps:$4 sm:$0xff]   ;;  %v4355_v41 = vld [vmem:[%s6845_s3 + $0xc0] ss:$16 sps:$4 sm:$0xff]   ;;  %v4356_v42 = vld [vmem:[%s6845_s3 + $0xe4] ss:$16 sps:$4 sm:$0xff]  }
   0xf   :  { %206 = vmatpush1.bf16.msra.mxu0 %v4293_v8  ;;  %771 = vmatpush1.bf16.msra.mxu1 %v4331_v22  ;;  %v4308_v43 = vld [vmem:[%s6844_s0 + $0x10] sm:$0xff]   ;;  %v4340_v44 = vld [vmem:[%s6845_s3 + $0x88] ss:$16 sps:$4 sm:$0xff]   ;;  %v4348_v45 = vld [vmem:[%s6845_s3 + $0xac] ss:$16 sps:$4 sm:$0xff]  }
  0x10   :  { %207 = vmatprep.subr.bf16.mxu0 %v4294_v9  ;;  %772 = vmatprep.subr.bf16.mxu1 %v4332_v24  ;;  %v4361_v46 = vld [vmem:[%s6845_s3 + $0xe0] ss:$16 sps:$4 sm:$0xff]   ;;  %v4362_v47 = vld [vmem:[%s6845_s3 + $0x104] ss:$16 sps:$4 sm:$0xff]   ;;  %v4346_v48 = vld [vmem:[%s6845_s3 + $0xa8] ss:$16 sps:$4 sm:$0xff]  }
  0x11   :  { %v4309_v49 = vld [vmem:[%s6844_s0 + $0x18] sm:$0xff]   ;;  %v4367_v51 = vld [vmem:[%s6845_s3 + $0x100] ss:$16 sps:$4 sm:$0xff]   ;;  %v4368_v52 = vld [vmem:[%s6845_s3 + $0x124] ss:$16 sps:$4 sm:$0xff]  }
  0x12   :  { %v4354_v50 = vld [vmem:[%s6845_s3 + $0xcc] ss:$16 sps:$4 sm:$0xff]   ;;  %v4352_v53 = vld [vmem:[%s6845_s3 + $0xc8] ss:$16 sps:$4 sm:$0xff]   ;;  %v4373_v55 = vld [vmem:[%s6845_s3 + $0x120] ss:$16 sps:$4 sm:$0xff]  }
  0x13   :  { %208 = vmatpush1.bf16.msra.mxu0 %v4296_v10  ;;  %773 = vmatpush1.bf16.msra.mxu1 %v4337_v28  ;;  %v4360_v54 = vld [vmem:[%s6845_s3 + $0xec] ss:$16 sps:$4 sm:$0xff]   ;;  %v4374_v56 = vld [vmem:[%s6845_s3 + $0x144] ss:$16 sps:$4 sm:$0xff]   ;;  %v4358_v57 = vld [vmem:[%s6845_s3 + $0xe8] ss:$16 sps:$4 sm:$0xff]  }
  0x14   :  { %209 = vmatprep.subr.bf16.mxu0 %v4297_v11  ;;  %774 = vmatprep.subr.bf16.mxu1 %v4338_v29  ;;  %v4366_v58 = vld [vmem:[%s6845_s3 + $0x10c] ss:$16 sps:$4 sm:$0xff]   ;;  %v4379_v59 = vld [vmem:[%s6845_s3 + $0x140] ss:$16 sps:$4 sm:$0xff]   ;;  %v4380_v60 = vld [vmem:[%s6845_s3 + $0x164] ss:$16 sps:$4 sm:$0xff]  }
  0x15   :  { %v4310_v61 = vld [vmem:[%s6844_s0 + $0x20] sm:$0xff]   ;;  %v4364_v62 = vld [vmem:[%s6845_s3 + $0x108] ss:$16 sps:$4 sm:$0xff]   ;;  %v4372_v63 = vld [vmem:[%s6845_s3 + $0x12c] ss:$16 sps:$4 sm:$0xff]  }
  0x16   :  { %v4385_v0 = vld [vmem:[%s6845_s3 + $0x160] ss:$16 sps:$4 sm:$0xff]   ;;  %v4386_v2 = vld [vmem:[%s6845_s3 + $0x184] ss:$16 sps:$4 sm:$0xff]   ;;  %v4370_v3 = vld [vmem:[%s6845_s3 + $0x128] ss:$16 sps:$4 sm:$0xff]  }
  0x17   :  { %210 = vmatpush1.bf16.msra.mxu0 %v4299_v12  ;;  %775 = vmatpush1.bf16.msra.mxu1 %v4343_v32  ;;  %v4378_v4 = vld [vmem:[%s6845_s3 + $0x14c] ss:$16 sps:$4 sm:$0xff]   ;;  %v4391_v5 = vld [vmem:[%s6845_s3 + $0x180] ss:$16 sps:$4 sm:$0xff]   ;;  %v4392_v6 = vld [vmem:[%s6845_s3 + $0x1a4] ss:$16 sps:$4 sm:$0xff]  }
  0x18   :  { %211 = vmatprep.subr.bf16.mxu0 %v4300_v14  ;;  %776 = vmatprep.subr.bf16.mxu1 %v4344_v33  ;;  %v4311_v7 = vld [vmem:[%s6844_s0 + $0x28] sm:$0xff]   ;;  %v4312_v12 = vld [vmem:[%s6844_s0 + $0x30] sm:$0xff]   ;;  %v4313_v16 = vld [vmem:[%s6844_s0 + $0x38] sm:$0xff]  }
  0x19   :  { %v4376_v8 = vld [vmem:[%s6845_s3 + $0x148] ss:$16 sps:$4 sm:$0xff]   ;;  %v4384_v9 = vld [vmem:[%s6845_s3 + $0x16c] ss:$16 sps:$4 sm:$0xff]   ;;  %v4403_v20 = vld [vmem:[%s6845_s3 + $0x1c0] ss:$16 sps:$4 sm:$0xff]  }
  0x1a   :  { %v4382_v10 = vld [vmem:[%s6845_s3 + $0x168] ss:$16 sps:$4 sm:$0xff]   ;;  %v4390_v11 = vld [vmem:[%s6845_s3 + $0x18c] ss:$16 sps:$4 sm:$0xff]   ;;  %v4409_v24 = vld [vmem:[%s6845_s3 + $0x1e0] ss:$16 sps:$4 sm:$0xff]  }
  0x1b   :  { %212 = vmatpush1.bf16.msra.mxu0 %v4302_v17  ;;  %777 = vmatpush1.bf16.msra.mxu1 %v4349_v37  ;;  %v4388_v13 = vld [vmem:[%s6845_s3 + $0x188] ss:$16 sps:$4 sm:$0xff]   ;;  %v4396_v14 = vld [vmem:[%s6845_s3 + $0x1ac] ss:$16 sps:$4 sm:$0xff]   ;;  %v4397_v17 = vld [vmem:[%s6845_s3 + $0x1a0] ss:$16 sps:$4 sm:$0xff]  }
  0x1c   :  { %213 = vmatprep.subr.bf16.mxu0 %v4303_v18  ;;  %778 = vmatprep.subr.bf16.mxu1 %v4350_v38  ;;  %v4394_v15 = vld [vmem:[%s6845_s3 + $0x1a8] ss:$16 sps:$4 sm:$0xff]   ;;  %v4402_v18 = vld [vmem:[%s6845_s3 + $0x1cc] ss:$16 sps:$4 sm:$0xff]   ;;  %v59_v29 = vld [vmem:[%s6847_s2] sm:$0x3] }
  0x1d   :  { %v4400_v19 = vld [vmem:[%s6845_s3 + $0x1c8] ss:$16 sps:$4 sm:$0xff]   ;;  %v4408_v22 = vld [vmem:[%s6845_s3 + $0x1ec] ss:$16 sps:$4 sm:$0xff]  }
  0x1f   :  { %214 = vmatpush1.bf16.msra.mxu0 %v4305_v21  ;;  %779 = vmatpush1.bf16.msra.mxu1 %v4355_v41  ;;  %v4404_v21 = vld [vmem:[%s6845_s3 + $0x1e4] ss:$16 sps:$4 sm:$0xff]  }
  0x20   :  { %879 = vmatprep.subr.bf16.mxu0 %v4318_v23  ;;  %780 = vmatprep.subr.bf16.mxu1 %v4356_v42  ;;  %v4406_v23 = vld [vmem:[%s6845_s3 + $0x1e8] ss:$16 sps:$4 sm:$0xff]  }
  0x22   :  { %232 = vmatmul.mubr.bf16.vlgmr.msra.gmra.mrb[0].mxu0 %v4306_v25  ;;  %v4412_v25 = vld [vmem:[%s6846_s5 + $0x4] ss:$28 sps:$4 sm:$0xff]  }
  0x23   :  { %241 = vmatprep.mubr.bf16.mxu0 %v4954_v1  ;;  %880 = vmatpush1.bf16.msra.mxu0 %v4316_v26  ;;  %v4415_v26 = vld [vmem:[%s6846_s5 + $0xc] ss:$28 sps:$4 sm:$0xff]  }
  0x24   :  { %881 = vmatprep.subr.bf16.mxu0 %v4324_v27  ;;  %781 = vmatpush1.bf16.msra.mxu1 %v4361_v46  ;;  %v61_v27 = vlaneseq  ;;  %v4410_v46 = vld [vmem:[%s6846_s5] ss:$28 sps:$4 sm:$0xff]  }
  0x25   :  { %782 = vmatprep.subr.bf16.mxu1 %v4362_v47  ;;  %v4413_v47 = vld [vmem:[%s6846_s5 + $0x8] ss:$28 sps:$4 sm:$0xff]  }
  0x26   :  { %v5273_v28 = vshrl.u32 %v61_v27, 7  ;;  %v4437_v27 = vld [vmem:[%s6846_s5 + $0xe8] ss:$28 sps:$4 sm:$0xff]  }
  0x27   :  { %882 = vmatpush1.bf16.msra.mxu0 %v4322_v30 }
  0x28   :  { %883 = vmatprep.subr.bf16.mxu0 %v4330_v31  ;;  %783 = vmatpush1.bf16.msra.mxu1 %v4367_v51  ;;  %v5279_v30 = vsub.s32 0, %v5273_v28  ;;  %v5282_v31 = vsub.s32 1, %v5273_v28 }
  0x29   :  { %784 = vmatprep.subr.bf16.mxu1 %v4368_v52 }
  0x2a   :  { %242 = vmatmul.mubr.bf16.gmra.mrb[4].mxu0 %v4307_v34  ;;  %v5285_v32 = vrot.slane %v59_v29, %v5279_v30  ;;  %v5288_v33 = vrot.slane %v59_v29, %v5282_v31 }
  0x2b   :  { %251 = vmatprep.mubr.bf16.mxu0 %v4954_v1  ;;  %884 = vmatpush1.bf16.msra.mxu0 %v4328_v35 }
  0x2c   :  { %885 = vmatprep.subr.bf16.mxu0 %v4336_v36  ;;  %785 = vmatpush1.bf16.msra.mxu1 %v4373_v55 }
  0x2d   :  { %786 = vmatprep.subr.bf16.mxu1 %v4374_v56 }
  0x2f   :  { %886 = vmatpush1.bf16.msra.mxu0 %v4334_v39 }
  0x30   :  { %887 = vmatprep.subr.bf16.mxu0 %v4342_v40  ;;  %787 = vmatpush1.bf16.msra.mxu1 %v4379_v59 }
  0x31   :  { %788 = vmatprep.subr.bf16.mxu1 %v4380_v60 }
  0x32   :  { %252 = vmatmul.mubr.bf16.gmra.mrb[8].mxu0 %v4308_v43 }
  0x33   :  { %261 = vmatprep.mubr.bf16.mxu0 %v4954_v1  ;;  %888 = vmatpush1.bf16.msra.mxu0 %v4340_v44 }
  0x34   :  { %889 = vmatprep.subr.bf16.mxu0 %v4348_v45  ;;  %789 = vmatpush1.bf16.msra.mxu1 %v4385_v0 }
  0x35   :  { %790 = vmatprep.subr.bf16.mxu1 %v4386_v2 }
  0x37   :  { %890 = vmatpush1.bf16.msra.mxu0 %v4346_v48 }
  0x38   :  { %891 = vmatprep.subr.bf16.mxu0 %v4354_v50  ;;  %791 = vmatpush1.bf16.msra.mxu1 %v4391_v5  ;;  %v4421_v50 = vld [vmem:[%s6846_s5 + $0x44] ss:$28 sps:$4 sm:$0xff]   ;;  %v4422_v5 = vld [vmem:[%s6846_s5 + $0x70] ss:$28 sps:$4 sm:$0xff]  }
  0x39   :  { %792 = vmatprep.subr.bf16.mxu1 %v4392_v6  ;;  %v4425_v6 = vld [vmem:[%s6846_s5 + $0x78] ss:$28 sps:$4 sm:$0xff]  }
  0x3a   :  { %262 = vmatmul.mubr.bf16.gmra.mrb[12].mxu0 %v4309_v49  ;;  %v4418_v49 = vld [vmem:[%s6846_s5 + $0x3c] ss:$28 sps:$4 sm:$0xff]  }
  0x3b   :  { %271 = vmatprep.mubr.bf16.mxu0 %v4954_v1  ;;  %892 = vmatpush1.bf16.msra.mxu0 %v4352_v53 }
  0x3c   :  { %893 = vmatprep.subr.bf16.mxu0 %v4360_v54  ;;  %793 = vmatpush1.bf16.msra.mxu1 %v4397_v17  ;;  %v4431_v17 = vld [vmem:[%s6846_s5 + $0xb0] ss:$28 sps:$4 sm:$0xff]  }
  0x3f   :  { %894 = vmatpush1.bf16.msra.mxu0 %v4358_v57  ;;  %v4416_v57 = vld [vmem:[%s6846_s5 + $0x38] ss:$28 sps:$4 sm:$0xff]  }
  0x40   :  { %895 = vmatprep.subr.bf16.mxu0 %v4366_v58  ;;  %v4419_v58 = vld [vmem:[%s6846_s5 + $0x40] ss:$28 sps:$4 sm:$0xff]  }
  0x42   :  { %272 = vmatmul.mubr.bf16.gmra.mrb[16].mxu0 %v4310_v61 }
  0x43   :  { %281 = vmatprep.mubr.bf16.mxu0 %v4954_v1  ;;  %896 = vmatpush1.bf16.msra.mxu0 %v4364_v62  ;;  %v4424_v62 = vld [vmem:[%s6846_s5 + $0x74] ss:$28 sps:$4 sm:$0xff]  }
  0x44   :  { %897 = vmatprep.subr.bf16.mxu0 %v4372_v63  ;;  %v4427_v63 = vld [vmem:[%s6846_s5 + $0x7c] ss:$28 sps:$4 sm:$0xff]  }
  0x47   :  { %898 = vmatpush1.bf16.msra.mxu0 %v4370_v3 }
  0x48   :  { %899 = vmatprep.subr.bf16.mxu0 %v4378_v4 }
  0x4a   :  { %282 = vmatmul.mubr.bf16.gmra.mrb[20].mxu0 %v4311_v7 }
  0x4b   :  { %291 = vmatprep.mubr.bf16.mxu0 %v4954_v1  ;;  %900 = vmatpush1.bf16.msra.mxu0 %v4376_v8  ;;  %v4430_v8 = vld [vmem:[%s6846_s5 + $0xac] ss:$28 sps:$4 sm:$0xff]  }
  0x4c   :  { %901 = vmatprep.subr.bf16.mxu0 %v4384_v9  ;;  %v4433_v9 = vld [vmem:[%s6846_s5 + $0xb4] ss:$28 sps:$4 sm:$0xff]  }
  0x4f   :  { %902 = vmatpush1.bf16.msra.mxu0 %v4382_v10 }
  0x50   :  { %903 = vmatprep.subr.bf16.mxu0 %v4390_v11 }
  0x52   :  { %292 = vmatmul.mubr.bf16.gmra.mrb[24].mxu0 %v4312_v12 }
  0x53   :  { %301 = vmatprep.mubr.bf16.mxu0 %v4954_v1  ;;  %904 = vmatpush1.bf16.msra.mxu0 %v4388_v13  ;;  %v4398_v1 = vld [vmem:[%s6845_s3 + $0x1c4] ss:$16 sps:$4 sm:$0xff]  }
  0x54   :  { %905 = vmatprep.subr.bf16.mxu0 %v4396_v14  ;;  %794 = vmatprep.subr.bf16.mxu1 %v4398_v1 }
  0x55   :  { %795 = vmatpush1.bf16.msra.mxu1 %v4403_v20  ;;  %v4436_v20 = vld [vmem:[%s6846_s5 + $0xe4] ss:$28 sps:$4 sm:$0xff]  }
  0x56   :  { %796 = vmatprep.subr.bf16.mxu1 %v4404_v21  ;;  %v4439_v21 = vld [vmem:[%s6846_s5 + $0xec] ss:$28 sps:$4 sm:$0xff]  }
  0x57   :  { %906 = vmatpush1.bf16.msra.mxu0 %v4394_v15 }
  0x58   :  { %907 = vmatprep.subr.bf16.mxu0 %v4402_v18 }
  0x59   :  { %797 = vmatpush1.bf16.msra.mxu1 %v4409_v24 }
  0x5a   :  { %302 = vmatmul.mubr.bf16.gmra.mrb[28].mxu0 %v4313_v16  ;;  %2533 = vmatprep.subr.bf16.mxu1 %v4412_v25  ;;  %v4428_v16 = vld [vmem:[%s6846_s5 + $0xa8] ss:$28 sps:$4 sm:$0xff]  }
  0x5b   :  { %908 = vmatpush1.bf16.msra.mxu0 %v4400_v19 }
  0x5c   :  { %909 = vmatprep.subr.bf16.mxu0 %v4408_v22 }
  0x5f   :  { %910 = vmatpush1.bf16.msra.mxu0 %v4406_v23 }
  0x60   :  { %2759 = vmatprep.subr.bf16.mxu0 %v4415_v26  ;;  %v4434_v26 = vld [vmem:[%s6846_s5 + $0xe0] ss:$28 sps:$4 sm:$0xff]  }
  0xf5   :  { %v233_v34 = vpop.f32.mrb[0].mxu0 }
  0xf6   :  { %v234_v35 = vadd.f32 %v233_v34, %v5285_v32  ;;  %v235_v36 = vpop.f32.mrb[1].mxu0  ;;  %v4442_v34 = vld [vmem:[%s6846_s5 + $0x11c] ss:$28 sps:$4 sm:$0xff]  }
  0xf7   :  { %v236_v37 = vadd.f32 %v235_v36, %v5288_v33  ;;  %v237_v38 = vpop.f32.mrb[2].mxu0 }
  0xf8   :  { %v238_v39 = vadd.f32 %v237_v38, %v5285_v32  ;;  %v239_v40 = vpop.f32.mrb[3].mxu0  ;;  %v312_v42 = vmax.f32 %v234_v35, 0.0  ;;  %v4445_v35 = vld [vmem:[%s6846_s5 + $0x124] ss:$28 sps:$4 sm:$0xff]  }
  0xf9   :  { %v240_v41 = vadd.f32 %v239_v40, %v5288_v33  ;;  %v313_v44 = vmax.f32 %v236_v37, 0.0 }
  0xfa   :  { %v314_v43 = vmax.f32 %v238_v39, 0.0 }
  0xfb   :  { %v315_v45 = vmax.f32 %v240_v41, 0.0 }
  0xfc   :  { %v344_v48 = vpack.c.bf16 %v314_v43, %v312_v42  ;;  %v4440_v42 = vld [vmem:[%s6846_s5 + $0x118] ss:$28 sps:$4 sm:$0xff]   ;;  %v4443_v43 = vld [vmem:[%s6846_s5 + $0x120] ss:$28 sps:$4 sm:$0xff]  }
  0xfd   :  { %v243_v51 = vpop.f32.mrb[4].mxu0  ;;  %v345_v52 = vpack.c.bf16 %v315_v45, %v313_v44 }
  0xfe   :  { %v244_v53 = vadd.f32 %v243_v51, %v5285_v32  ;;  %v245_v54 = vpop.f32.mrb[5].mxu0 }
  0xff   :  { %v246_v55 = vadd.f32 %v245_v54, %v5288_v33  ;;  %v247_v56 = vpop.f32.mrb[6].mxu0  ;;  %798 = vmatprep.mubr.bf16.mxu1 %v345_v52  ;;  %911 = vmatprep.mubr.bf16.mxu0 %v345_v52  ;;  %v4449_v54 = vld [vmem:[%s6846_s5 + $0x158] ss:$28 sps:$4 sm:$0xff]  }
 0x100   :  { %v316_v59 = vmax.f32 %v244_v53, 0.0  ;;  %v248_v60 = vadd.f32 %v247_v56, %v5285_v32  ;;  %v249_v61 = vpop.f32.mrb[7].mxu0  ;;  %799 = vmatmul.mubr.bf16.vlgmr.msra.gmra.mrb[0].mxu1 %v344_v48  ;;  %912 = vmatmul.mubr.bf16.vlgmr.msra.gmra.mrb[32].mxu0 %v344_v48  ;;  %v4446_v53 = vld [vmem:[%s6846_s5 + $0x150] ss:$28 sps:$4 sm:$0xff]  }
 0x101   :  { %v317_v0 = vmax.f32 %v246_v55, 0.0  ;;  %v250_v2 = vadd.f32 %v249_v61, %v5288_v33  ;;  %2534 = vmatpush1.bf16.msra.mxu1 %v4410_v46  ;;  %2760 = vmatpush1.bf16.msra.mxu0 %v4413_v47  ;;  %v4448_v46 = vld [vmem:[%s6846_s5 + $0x154] ss:$28 sps:$4 sm:$0xff]   ;;  %v4451_v47 = vld [vmem:[%s6846_s5 + $0x15c] ss:$28 sps:$4 sm:$0xff]  }
 0x102   :  { %v318_v3 = vmax.f32 %v248_v60, 0.0  ;;  %2535 = vmatprep.subr.bf16.mxu1 %v4418_v49  ;;  %2761 = vmatprep.subr.bf16.mxu0 %v4421_v50  ;;  %v4454_v56 = vld [vmem:[%s6846_s5 + $0x18c] ss:$28 sps:$4 sm:$0xff]  }
 0x103   :  { %v319_v4 = vmax.f32 %v250_v2, 0.0  ;;  %v4455_v2 = vld [vmem:[%s6846_s5 + $0x190] ss:$28 sps:$4 sm:$0xff]  }
 0x104   :  { %v346_v7 = vpack.c.bf16 %v318_v3, %v316_v59 }
 0x105   :  { %v347_v10 = vpack.c.bf16 %v319_v4, %v317_v0  ;;  %v253_v11 = vpop.f32.mrb[8].mxu0  ;;  %2536 = vmatpush1.bf16.msra.mxu1 %v4416_v57  ;;  %2762 = vmatpush1.bf16.msra.mxu0 %v4419_v58  ;;  %v4457_v57 = vld [vmem:[%s6846_s5 + $0x194] ss:$28 sps:$4 sm:$0xff]   ;;  %v4452_v0 = vld [vmem:[%s6846_s5 + $0x188] ss:$28 sps:$4 sm:$0xff]  }
 0x106   :  { %v254_v12 = vadd.f32 %v253_v11, %v5285_v32  ;;  %v255_v13 = vpop.f32.mrb[9].mxu0  ;;  %2537 = vmatprep.subr.bf16.mxu1 %v4424_v62  ;;  %2763 = vmatprep.subr.bf16.mxu0 %v4427_v63 }
 0x107   :  { %v256_v14 = vadd.f32 %v255_v13, %v5288_v33  ;;  %v257_v15 = vpop.f32.mrb[10].mxu0  ;;  %808 = vmatprep.mubr.bf16.mxu1 %v347_v10  ;;  %921 = vmatprep.mubr.bf16.mxu0 %v347_v10  ;;  %v4461_v13 = vld [vmem:[%s6846_s5 + $0x1c8] ss:$28 sps:$4 sm:$0xff]  }
 0x108   :  { %v320_v1 = vmax.f32 %v254_v12, 0.0  ;;  %v258_v18 = vadd.f32 %v257_v15, %v5285_v32  ;;  %v259_v19 = vpop.f32.mrb[11].mxu0  ;;  %809 = vmatmul.mubr.bf16.gmra.mrb[4].mxu1 %v346_v7  ;;  %922 = vmatmul.mubr.bf16.gmra.mrb[36].mxu0 %v346_v7  ;;  %v4458_v12 = vld [vmem:[%s6846_s5 + $0x1c0] ss:$28 sps:$4 sm:$0xff]  }
 0x109   :  { %v321_v22 = vmax.f32 %v256_v14, 0.0  ;;  %v260_v23 = vadd.f32 %v259_v19, %v5288_v33  ;;  %2538 = vmatpush1.bf16.msra.mxu1 %v4422_v5  ;;  %2764 = vmatpush1.bf16.msra.mxu0 %v4425_v6  ;;  %v4460_v5 = vld [vmem:[%s6846_s5 + $0x1c4] ss:$28 sps:$4 sm:$0xff]   ;;  %v4463_v6 = vld [vmem:[%s6846_s5 + $0x1cc] ss:$28 sps:$4 sm:$0xff]  }
 0x10a   :  { %v322_v24 = vmax.f32 %v258_v18, 0.0  ;;  %2539 = vmatprep.subr.bf16.mxu1 %v4430_v8  ;;  %2765 = vmatprep.subr.bf16.mxu0 %v4433_v9  ;;  %v4466_v15 = vld [vmem:[%s6846_s5 + $0x1fc] ss:$28 sps:$4 sm:$0xff]  }
 0x10b   :  { %v323_v25 = vmax.f32 %v260_v23, 0.0  ;;  %v4467_v23 = vld [vmem:[%s6846_s5 + $0x200] ss:$28 sps:$4 sm:$0xff]  }
 0x10c   :  { %v348_v29 = vpack.c.bf16 %v322_v24, %v320_v1 }
 0x10d   :  { %v349_v36 = vpack.c.bf16 %v323_v25, %v321_v22  ;;  %v263_v37 = vpop.f32.mrb[12].mxu0  ;;  %2540 = vmatpush1.bf16.msra.mxu1 %v4428_v16  ;;  %2766 = vmatpush1.bf16.msra.mxu0 %v4431_v17  ;;  %v4469_v16 = vld [vmem:[%s6846_s5 + $0x204] ss:$28 sps:$4 sm:$0xff]   ;;  %v4464_v22 = vld [vmem:[%s6846_s5 + $0x1f8] ss:$28 sps:$4 sm:$0xff]  }
 0x10e   :  { %v264_v38 = vadd.f32 %v263_v37, %v5285_v32  ;;  %v265_v39 = vpop.f32.mrb[13].mxu0  ;;  %2541 = vmatprep.subr.bf16.mxu1 %v4436_v20  ;;  %2767 = vmatprep.subr.bf16.mxu0 %v4439_v21 }
 0x10f   :  { %v266_v40 = vadd.f32 %v265_v39, %v5288_v33  ;;  %v267_v41 = vpop.f32.mrb[14].mxu0  ;;  %818 = vmatprep.mubr.bf16.mxu1 %v349_v36  ;;  %931 = vmatprep.mubr.bf16.mxu0 %v349_v36 }
 0x110   :  { %v268_v44 = vadd.f32 %v267_v41, %v5285_v32  ;;  %v269_v45 = vpop.f32.mrb[15].mxu0  ;;  %819 = vmatmul.mubr.bf16.gmra.mrb[8].mxu1 %v348_v29  ;;  %932 = vmatmul.mubr.bf16.gmra.mrb[40].mxu0 %v348_v29  ;;  %v324_v48 = vmax.f32 %v264_v38, 0.0  ;;  %v4470_v41 = vld [vmem:[%s6846_s5 + $0x230] ss:$28 sps:$4 sm:$0xff]  }
 0x111   :  { %v325_v49 = vmax.f32 %v266_v40, 0.0  ;;  %v270_v50 = vadd.f32 %v269_v45, %v5288_v33  ;;  %2542 = vmatpush1.bf16.msra.mxu1 %v4434_v26  ;;  %2768 = vmatpush1.bf16.msra.mxu0 %v4437_v27  ;;  %v4478_v45 = vld [vmem:[%s6846_s5 + $0x26c] ss:$28 sps:$4 sm:$0xff]  }
 0x112   :  { %v326_v51 = vmax.f32 %v268_v44, 0.0  ;;  %2543 = vmatprep.subr.bf16.mxu1 %v4442_v34  ;;  %2769 = vmatprep.subr.bf16.mxu0 %v4445_v35  ;;  %v4472_v34 = vld [vmem:[%s6846_s5 + $0x234] ss:$28 sps:$4 sm:$0xff]   ;;  %v4475_v35 = vld [vmem:[%s6846_s5 + $0x23c] ss:$28 sps:$4 sm:$0xff]  }
 0x113   :  { %v327_v52 = vmax.f32 %v270_v50, 0.0 }
 0x114   :  { %v350_v55 = vpack.c.bf16 %v326_v51, %v324_v48 }
 0x115   :  { %v351_v58 = vpack.c.bf16 %v327_v52, %v325_v49  ;;  %v273_v59 = vpop.f32.mrb[16].mxu0  ;;  %2544 = vmatpush1.bf16.msra.mxu1 %v4440_v42  ;;  %2770 = vmatpush1.bf16.msra.mxu0 %v4443_v43  ;;  %v4473_v42 = vld [vmem:[%s6846_s5 + $0x238] ss:$28 sps:$4 sm:$0xff]   ;;  %v4476_v52 = vld [vmem:[%s6846_s5 + $0x268] ss:$28 sps:$4 sm:$0xff]  }
 0x116   :  { %v274_v60 = vadd.f32 %v273_v59, %v5285_v32  ;;  %v275_v61 = vpop.f32.mrb[17].mxu0  ;;  %2545 = vmatprep.subr.bf16.mxu1 %v4448_v46  ;;  %2771 = vmatprep.subr.bf16.mxu0 %v4451_v47  ;;  %v4481_v46 = vld [vmem:[%s6846_s5 + $0x274] ss:$28 sps:$4 sm:$0xff]  }
 0x117   :  { %v276_v62 = vadd.f32 %v275_v61, %v5288_v33  ;;  %v277_v63 = vpop.f32.mrb[18].mxu0  ;;  %828 = vmatprep.mubr.bf16.mxu1 %v351_v58  ;;  %941 = vmatprep.mubr.bf16.mxu0 %v351_v58 }
 0x118   :  { %v278_v3 = vadd.f32 %v277_v63, %v5285_v32  ;;  %v279_v4 = vpop.f32.mrb[19].mxu0  ;;  %829 = vmatmul.mubr.bf16.gmra.mrb[12].mxu1 %v350_v55  ;;  %942 = vmatmul.mubr.bf16.gmra.mrb[44].mxu0 %v350_v55  ;;  %v328_v7 = vmax.f32 %v274_v60, 0.0  ;;  %v4482_v63 = vld [vmem:[%s6846_s5 + $0x2a0] ss:$28 sps:$4 sm:$0xff]  }
 0x119   :  { %v329_v8 = vmax.f32 %v276_v62, 0.0  ;;  %v280_v9 = vadd.f32 %v279_v4, %v5288_v33  ;;  %2546 = vmatpush1.bf16.msra.mxu1 %v4446_v53  ;;  %2772 = vmatpush1.bf16.msra.mxu0 %v4449_v54  ;;  %v4479_v53 = vld [vmem:[%s6846_s5 + $0x270] ss:$28 sps:$4 sm:$0xff]   ;;  %v4490_v4 = vld [vmem:[%s6846_s5 + $0x2dc] ss:$28 sps:$4 sm:$0xff]  }
 0x11a   :  { %v330_v10 = vmax.f32 %v278_v3, 0.0  ;;  %2547 = vmatprep.subr.bf16.mxu1 %v4454_v56  ;;  %2773 = vmatprep.subr.bf16.mxu0 %v4457_v57  ;;  %v4484_v56 = vld [vmem:[%s6846_s5 + $0x2a4] ss:$28 sps:$4 sm:$0xff]   ;;  %v4487_v57 = vld [vmem:[%s6846_s5 + $0x2ac] ss:$28 sps:$4 sm:$0xff]  }
 0x11b   :  { %v331_v11 = vmax.f32 %v280_v9, 0.0 }
 0x11c   :  { %v352_v14 = vpack.c.bf16 %v330_v10, %v328_v7 }
 0x11d   :  { %v353_v17 = vpack.c.bf16 %v331_v11, %v329_v8  ;;  %v283_v1 = vpop.f32.mrb[20].mxu0  ;;  %2548 = vmatpush1.bf16.msra.mxu1 %v4452_v0  ;;  %2774 = vmatpush1.bf16.msra.mxu0 %v4455_v2  ;;  %v4485_v0 = vld [vmem:[%s6846_s5 + $0x2a8] ss:$28 sps:$4 sm:$0xff]   ;;  %v4488_v11 = vld [vmem:[%s6846_s5 + $0x2d8] ss:$28 sps:$4 sm:$0xff]  }
 0x11e   :  { %v284_v18 = vadd.f32 %v283_v1, %v5285_v32  ;;  %v285_v19 = vpop.f32.mrb[21].mxu0  ;;  %2549 = vmatprep.subr.bf16.mxu1 %v4460_v5  ;;  %2775 = vmatprep.subr.bf16.mxu0 %v4463_v6  ;;  %v4493_v5 = vld [vmem:[%s6846_s5 + $0x2e4] ss:$28 sps:$4 sm:$0xff]   ;;  %v4499_v1 = vld [vmem:[%s6846_s5 + $0x31c] ss:$28 sps:$4 sm:$0xff]  }
 0x11f   :  { %v286_v20 = vadd.f32 %v285_v19, %v5288_v33  ;;  %v287_v21 = vpop.f32.mrb[22].mxu0  ;;  %838 = vmatprep.mubr.bf16.mxu1 %v353_v17  ;;  %951 = vmatprep.mubr.bf16.mxu0 %v353_v17  ;;  %v4497_v19 = vld [vmem:[%s6846_s5 + $0x318] ss:$28 sps:$4 sm:$0xff]  }
 0x120   :  { %v288_v24 = vadd.f32 %v287_v21, %v5285_v32  ;;  %v289_v25 = vpop.f32.mrb[23].mxu0  ;;  %839 = vmatmul.mubr.bf16.gmra.mrb[16].mxu1 %v352_v14  ;;  %952 = vmatmul.mubr.bf16.gmra.mrb[48].mxu0 %v352_v14  ;;  %v332_v27 = vmax.f32 %v284_v18, 0.0  ;;  %v4494_v18 = vld [vmem:[%s6846_s5 + $0x310] ss:$28 sps:$4 sm:$0xff]  }
 0x121   :  { %v290_v26 = vadd.f32 %v289_v25, %v5288_v33  ;;  %2550 = vmatpush1.bf16.msra.mxu1 %v4458_v12  ;;  %2776 = vmatpush1.bf16.msra.mxu0 %v4461_v13  ;;  %v333_v36 = vmax.f32 %v286_v20, 0.0  ;;  %v4491_v12 = vld [vmem:[%s6846_s5 + $0x2e0] ss:$28 sps:$4 sm:$0xff]   ;;  %v4502_v20 = vld [vmem:[%s6846_s5 + $0x34c] ss:$28 sps:$4 sm:$0xff]  }
 0x122   :  { %v334_v29 = vmax.f32 %v288_v24, 0.0  ;;  %2551 = vmatprep.subr.bf16.mxu1 %v4466_v15  ;;  %2777 = vmatprep.subr.bf16.mxu0 %v4469_v16  ;;  %v4505_v21 = vld [vmem:[%s6846_s5 + $0x354] ss:$28 sps:$4 sm:$0xff]   ;;  %v4508_v24 = vld [vmem:[%s6846_s5 + $0x384] ss:$28 sps:$4 sm:$0xff]  }
 0x123   :  { %v335_v37 = vmax.f32 %v290_v26, 0.0  ;;  %v4511_v25 = vld [vmem:[%s6846_s5 + $0x38c] ss:$28 sps:$4 sm:$0xff]   ;;  %v436_v26 = vsub.s32 2, %v5273_v28 }
 0x124   :  { %v354_v38 = vpack.c.bf16 %v334_v29, %v332_v27  ;;  %v424_v27 = vld [vmem:[%s6848_s4] sm:$0xf]  ;;  %v440_v29 = vsub.s32 3, %v5273_v28 }
 0x125   :  { %v355_v39 = vpack.c.bf16 %v335_v37, %v333_v36  ;;  %v293_v40 = vpop.f32.mrb[24].mxu0  ;;  %2552 = vmatpush1.bf16.msra.mxu1 %v4464_v22  ;;  %2778 = vmatpush1.bf16.msra.mxu0 %v4467_v23  ;;  %v4500_v22 = vld [vmem:[%s6846_s5 + $0x348] ss:$28 sps:$4 sm:$0xff]   ;;  %v4503_v23 = vld [vmem:[%s6846_s5 + $0x350] ss:$28 sps:$4 sm:$0xff]   ;;  %v5527_v36 = vrot.slane %v424_v27, %v5282_v31 }
 0x126   :  { %v294_v43 = vadd.f32 %v293_v40, %v5285_v32  ;;  %v295_v44 = vpop.f32.mrb[25].mxu0  ;;  %2553 = vmatprep.subr.bf16.mxu1 %v4472_v34  ;;  %2779 = vmatprep.subr.bf16.mxu0 %v4475_v35  ;;  %v5520_v34 = vrot.slane %v424_v27, %v5279_v30  ;;  %v5524_v35 = vrot.slane %v424_v27, %v436_v26 }
 0x127   :  { %v296_v47 = vadd.f32 %v295_v44, %v5288_v33  ;;  %v297_v48 = vpop.f32.mrb[26].mxu0  ;;  %848 = vmatprep.mubr.bf16.mxu1 %v355_v39  ;;  %961 = vmatprep.mubr.bf16.mxu0 %v355_v39  ;;  %v5531_v37 = vrot.slane %v424_v27, %v440_v29 }
 0x128   :  { %v298_v49 = vadd.f32 %v297_v48, %v5285_v32  ;;  %v299_v50 = vpop.f32.mrb[27].mxu0  ;;  %849 = vmatmul.mubr.bf16.gmra.mrb[20].mxu1 %v354_v38  ;;  %962 = vmatmul.mubr.bf16.gmra.mrb[52].mxu0 %v354_v38  ;;  %v336_v54 = vmax.f32 %v294_v43, 0.0 }
 0x129   :  { %v300_v51 = vadd.f32 %v299_v50, %v5288_v33  ;;  %2554 = vmatpush1.bf16.msra.mxu1 %v4470_v41  ;;  %2780 = vmatpush1.bf16.msra.mxu0 %v4473_v42  ;;  %v337_v58 = vmax.f32 %v296_v47, 0.0 }
 0x12a   :  { %v338_v55 = vmax.f32 %v298_v49, 0.0  ;;  %2555 = vmatprep.subr.bf16.mxu1 %v4478_v45  ;;  %2781 = vmatprep.subr.bf16.mxu0 %v4481_v46 }
 0x12b   :  { %v339_v59 = vmax.f32 %v300_v51, 0.0 }
 0x12c   :  { %v356_v60 = vpack.c.bf16 %v338_v55, %v336_v54 }
 0x12d   :  { %v357_v61 = vpack.c.bf16 %v339_v59, %v337_v58  ;;  %v303_v62 = vpop.f32.mrb[28].mxu0  ;;  %2556 = vmatpush1.bf16.msra.mxu1 %v4476_v52  ;;  %2782 = vmatpush1.bf16.msra.mxu0 %v4479_v53 }
 0x12e   :  { %v304_v2 = vadd.f32 %v303_v62, %v5285_v32  ;;  %v305_v3 = vpop.f32.mrb[29].mxu0  ;;  %2557 = vmatprep.subr.bf16.mxu1 %v4484_v56  ;;  %2783 = vmatprep.subr.bf16.mxu0 %v4487_v57 }
 0x12f   :  { %v306_v6 = vadd.f32 %v305_v3, %v5288_v33  ;;  %v307_v7 = vpop.f32.mrb[30].mxu0  ;;  %858 = vmatprep.mubr.bf16.mxu1 %v357_v61  ;;  %971 = vmatprep.mubr.bf16.mxu0 %v357_v61 }
 0x130   :  { %v308_v8 = vadd.f32 %v307_v7, %v5285_v32  ;;  %v309_v9 = vpop.f32.mrb[31].mxu0  ;;  %859 = vmatmul.mubr.bf16.gmra.mrb[24].mxu1 %v356_v60  ;;  %972 = vmatmul.mubr.bf16.gmra.mrb[56].mxu0 %v356_v60  ;;  %v340_v13 = vmax.f32 %v304_v2, 0.0 }
 0x131   :  { %v310_v10 = vadd.f32 %v309_v9, %v5288_v33  ;;  %2558 = vmatpush1.bf16.msra.mxu1 %v4482_v63  ;;  %2784 = vmatpush1.bf16.msra.mxu0 %v4485_v0  ;;  %v341_v32 = vmax.f32 %v306_v6, 0.0  ;;  %v4496_v33 = vld [vmem:[%s6846_s5 + $0x314] ss:$28 sps:$4 sm:$0xff]   ;;  %v4509_v6 = vld [vmem:[%s6846_s5 + $0x388] ss:$28 sps:$4 sm:$0xff]  }
 0x132   :  { %v342_v14 = vmax.f32 %v308_v8, 0.0  ;;  %2559 = vmatprep.subr.bf16.mxu1 %v4490_v4  ;;  %2785 = vmatprep.subr.bf16.mxu0 %v4493_v5  ;;  %v4506_v5 = vld [vmem:[%s6846_s5 + $0x380] ss:$28 sps:$4 sm:$0xff]  }
 0x133   :  { %v343_v15 = vmax.f32 %v310_v10, 0.0 }
 0x134   :  { %v358_v16 = vpack.c.bf16 %v342_v14, %v340_v13 }
 0x135   :  { %v359_v17 = vpack.c.bf16 %v343_v15, %v341_v32  ;;  %2560 = vmatpush1.bf16.msra.mxu1 %v4488_v11  ;;  %2786 = vmatpush1.bf16.msra.mxu0 %v4491_v12  ;;  %v4514_v11 = vld [vmem:[%s6846_s5 + $0x3bc] ss:$28 sps:$4 sm:$0xff]   ;;  %v4517_v12 = vld [vmem:[%s6846_s5 + $0x3c4] ss:$28 sps:$4 sm:$0xff]  }
 0x136   :  { %2561 = vmatprep.subr.bf16.mxu1 %v4496_v33  ;;  %2787 = vmatprep.subr.bf16.mxu0 %v4499_v1 }
 0x137   :  { %868 = vmatprep.mubr.bf16.mxu1 %v359_v17  ;;  %981 = vmatprep.mubr.bf16.mxu0 %v359_v17 }
 0x138   :  { %869 = vmatmul.mubr.bf16.gmra.mrb[28].mxu1 %v358_v16  ;;  %982 = vmatmul.mubr.bf16.gmra.mrb[60].mxu0 %v358_v16 }
 0x139   :  { %2562 = vmatpush1.bf16.msra.mxu1 %v4494_v18  ;;  %2788 = vmatpush1.bf16.msra.mxu0 %v4497_v19 }
 0x13a   :  { %2563 = vmatprep.subr.bf16.mxu1 %v4502_v20  ;;  %2789 = vmatprep.subr.bf16.mxu0 %v4505_v21  ;;  %v4512_v20 = vld [vmem:[%s6846_s5 + $0x3b8] ss:$28 sps:$4 sm:$0xff]   ;;  %v4515_v21 = vld [vmem:[%s6846_s5 + $0x3c0] ss:$28 sps:$4 sm:$0xff]  }
 0x13d   :  { %2564 = vmatpush1.bf16.msra.mxu1 %v4500_v22  ;;  %2790 = vmatpush1.bf16.msra.mxu0 %v4503_v23  ;;  %v4520_v22 = vld [vmem:[%s6846_s5 + $0x3f4] ss:$28 sps:$4 sm:$0xff]  }
 0x13e   :  { %2646 = vmatprep.subr.bf16.mxu1 %v4508_v24  ;;  %2872 = vmatprep.subr.bf16.mxu0 %v4511_v25 }
 0x1d3   :  { %v800_v38 = vpop.f32.mrb[0].mxu1  ;;  %v913_v39 = vpop.f32.mrb[32].mxu0 }
 0x1d4   :  { %v801_v40 = vadd.f32 %v800_v38, %v5520_v34  ;;  %v914_v41 = vadd.f32 %v913_v39, %v5524_v35  ;;  %v802_v42 = vpop.f32.mrb[1].mxu1  ;;  %v915_v43 = vpop.f32.mrb[33].mxu0  ;;  %v4523_v38 = vld [vmem:[%s6846_s5 + $0x3fc] ss:$28 sps:$4 sm:$0xff]  }
 0x1d5   :  { %v803_v44 = vadd.f32 %v802_v42, %v5527_v36  ;;  %v916_v45 = vadd.f32 %v915_v43, %v5531_v37  ;;  %v804_v46 = vpop.f32.mrb[2].mxu1  ;;  %v917_v47 = vpop.f32.mrb[34].mxu0 }
 0x1d6   :  { %v805_v48 = vadd.f32 %v804_v46, %v5520_v34  ;;  %v918_v49 = vadd.f32 %v917_v47, %v5524_v35  ;;  %v806_v50 = vpop.f32.mrb[3].mxu1  ;;  %v919_v51 = vpop.f32.mrb[35].mxu0  ;;  %v992_v54 = vmax.f32 %v801_v40, 0.0  ;;  %v994_v55 = vmax.f32 %v914_v41, 0.0 }
 0x1d7   :  { %v807_v52 = vadd.f32 %v806_v50, %v5527_v36  ;;  %v920_v53 = vadd.f32 %v919_v51, %v5531_v37  ;;  %v993_v58 = vmax.f32 %v803_v44, 0.0  ;;  %v995_v59 = vmax.f32 %v916_v45, 0.0  ;;  %v4521_v50 = vld [vmem:[%s6846_s5 + $0x3f8] ss:$28 sps:$4 sm:$0xff]  }
 0x1d8   :  { %v996_v56 = vmax.f32 %v805_v48, 0.0  ;;  %v998_v57 = vmax.f32 %v918_v49, 0.0  ;;  %v4518_v49 = vld [vmem:[%s6846_s5 + $0x3f0] ss:$28 sps:$4 sm:$0xff]  }
 0x1d9   :  { %v997_v60 = vmax.f32 %v807_v52, 0.0  ;;  %v999_v61 = vmax.f32 %v920_v53, 0.0 }
 0x1da   :  { %v5541_v62 = vpack.c.bf16 %v996_v56, %v992_v54  ;;  %v5543_v63 = vpack.c.bf16 %v998_v57, %v994_v55  ;;  %v4526_v55 = vld [vmem:[%s6846_s5 + $0x42c] ss:$28 sps:$4 sm:$0xff]   ;;  %v4529_v56 = vld [vmem:[%s6846_s5 + $0x434] ss:$28 sps:$4 sm:$0xff]  }
 0x1db   :  { %v5545_v0 = vpack.c.bf16 %v997_v60, %v993_v58  ;;  %v5547_v2 = vpack.c.bf16 %v999_v61, %v995_v59  ;;  %v810_v3 = vpop.f32.mrb[4].mxu1  ;;  %v923_v4 = vpop.f32.mrb[36].mxu0 }
 0x1dc   :  { %v811_v7 = vadd.f32 %v810_v3, %v5520_v34  ;;  %v924_v8 = vadd.f32 %v923_v4, %v5524_v35  ;;  %v812_v9 = vpop.f32.mrb[5].mxu1  ;;  %v925_v10 = vpop.f32.mrb[37].mxu0 }
 0x1dd   :  { %v813_v13 = vadd.f32 %v812_v9, %v5527_v36  ;;  %v926_v14 = vadd.f32 %v925_v10, %v5531_v37  ;;  %v814_v32 = vpop.f32.mrb[6].mxu1  ;;  %v927_v15 = vpop.f32.mrb[38].mxu0  ;;  %2565 = vmatprep.mubr.bf16.mxu1 %v5545_v0  ;;  %2791 = vmatprep.mubr.bf16.mxu0 %v5545_v0  ;;  %v4527_v9 = vld [vmem:[%s6846_s5 + $0x430] ss:$28 sps:$4 sm:$0xff]   ;;  %v4532_v10 = vld [vmem:[%s6846_s5 + $0x464] ss:$28 sps:$4 sm:$0xff]  }
 0x1de   :  { %v815_v16 = vadd.f32 %v814_v32, %v5520_v34  ;;  %v928_v17 = vadd.f32 %v927_v15, %v5524_v35  ;;  %v816_v33 = vpop.f32.mrb[7].mxu1  ;;  %v929_v1 = vpop.f32.mrb[39].mxu0  ;;  %2566 = vmatmul.mubr.bf16.vlgmr.msra.gmra.mrb[32].mxu1 %v5541_v62  ;;  %2792 = vmatmul.mubr.bf16.vlgmr.msra.gmra.mrb[64].mxu0 %v5541_v62  ;;  %v1000_v23 = vmax.f32 %v811_v7, 0.0  ;;  %v1002_v24 = vmax.f32 %v924_v8, 0.0  ;;  %v4524_v8 = vld [vmem:[%s6846_s5 + $0x428] ss:$28 sps:$4 sm:$0xff]  }
 0x1df   :  { %v817_v18 = vadd.f32 %v816_v33, %v5527_v36  ;;  %v930_v19 = vadd.f32 %v929_v1, %v5531_v37  ;;  %2647 = vmatpush1.bf16.msra.mxu1 %v4506_v5  ;;  %2873 = vmatpush1.bf16.msra.mxu0 %v4509_v6  ;;  %v1001_v39 = vmax.f32 %v813_v13, 0.0  ;;  %v1003_v40 = vmax.f32 %v926_v14, 0.0  ;;  %v4535_v32 = vld [vmem:[%s6846_s5 + $0x46c] ss:$28 sps:$4 sm:$0xff]  }
 0x1e0   :  { %v1004_v25 = vmax.f32 %v815_v16, 0.0  ;;  %v1006_v27 = vmax.f32 %v928_v17, 0.0  ;;  %2648 = vmatprep.subr.bf16.mxu1 %v4514_v11  ;;  %2874 = vmatprep.subr.bf16.mxu0 %v4517_v12 }
 0x1e1   :  { %v1005_v41 = vmax.f32 %v817_v18, 0.0  ;;  %v1007_v42 = vmax.f32 %v930_v19, 0.0 }
 0x1e2   :  { %v5585_v43 = vpack.c.bf16 %v1004_v25, %v1000_v23  ;;  %v5587_v44 = vpack.c.bf16 %v1006_v27, %v1002_v24  ;;  %v4530_v23 = vld [vmem:[%s6846_s5 + $0x460] ss:$28 sps:$4 sm:$0xff]   ;;  %v4533_v24 = vld [vmem:[%s6846_s5 + $0x468] ss:$28 sps:$4 sm:$0xff]  }
 0x1e3   :  { %v5589_v45 = vpack.c.bf16 %v1005_v41, %v1001_v39  ;;  %v5591_v46 = vpack.c.bf16 %v1007_v42, %v1003_v40  ;;  %2649 = vmatpush1.bf16.msra.mxu1 %v4512_v20  ;;  %v820_v47 = vpop.f32.mrb[8].mxu1  ;;  %v933_v48 = vpop.f32.mrb[40].mxu0  ;;  %2875 = vmatpush1.bf16.msra.mxu0 %v4515_v21  ;;  %v4538_v40 = vld [vmem:[%s6846_s5 + $0x49c] ss:$28 sps:$4 sm:$0xff]   ;;  %v4541_v41 = vld [vmem:[%s6846_s5 + $0x4a4] ss:$28 sps:$4 sm:$0xff]  }
 0x1e4   :  { %v821_v51 = vadd.f32 %v820_v47, %v5520_v34  ;;  %v934_v52 = vadd.f32 %v933_v48, %v5524_v35  ;;  %v822_v53 = vpop.f32.mrb[9].mxu1  ;;  %v935_v54 = vpop.f32.mrb[41].mxu0  ;;  %2650 = vmatprep.subr.bf16.mxu1 %v4520_v22  ;;  %2876 = vmatprep.subr.bf16.mxu0 %v4523_v38 }
 0x1e5   :  { %v823_v57 = vadd.f32 %v822_v53, %v5527_v36  ;;  %v936_v58 = vadd.f32 %v935_v54, %v5531_v37  ;;  %v824_v59 = vpop.f32.mrb[10].mxu1  ;;  %v937_v60 = vpop.f32.mrb[42].mxu0  ;;  %2575 = vmatprep.mubr.bf16.mxu1 %v5589_v45  ;;  %2801 = vmatprep.mubr.bf16.mxu0 %v5589_v45 }
 0x1e6   :  { %v825_v61 = vadd.f32 %v824_v59, %v5520_v34  ;;  %v938_v3 = vadd.f32 %v937_v60, %v5524_v35  ;;  %v826_v4 = vpop.f32.mrb[11].mxu1  ;;  %v939_v5 = vpop.f32.mrb[43].mxu0  ;;  %2576 = vmatmul.mubr.bf16.gmra.mrb[36].mxu1 %v5585_v43  ;;  %2802 = vmatmul.mubr.bf16.gmra.mrb[68].mxu0 %v5585_v43  ;;  %v1008_v11 = vmax.f32 %v821_v51, 0.0  ;;  %v1010_v12 = vmax.f32 %v934_v52, 0.0 }
 0x1e7   :  { %v827_v6 = vadd.f32 %v826_v4, %v5527_v36  ;;  %v940_v7 = vadd.f32 %v939_v5, %v5531_v37  ;;  %2651 = vmatpush1.bf16.msra.mxu1 %v4518_v49  ;;  %2877 = vmatpush1.bf16.msra.mxu0 %v4521_v50  ;;  %v1009_v15 = vmax.f32 %v823_v57, 0.0  ;;  %v1011_v16 = vmax.f32 %v936_v58, 0.0  ;;  %v4539_v57 = vld [vmem:[%s6846_s5 + $0x4a0] ss:$28 sps:$4 sm:$0xff]   ;;  %v4544_v58 = vld [vmem:[%s6846_s5 + $0x4d4] ss:$28 sps:$4 sm:$0xff]  }
 0x1e8   :  { %v1012_v13 = vmax.f32 %v825_v61, 0.0  ;;  %v1014_v14 = vmax.f32 %v938_v3, 0.0  ;;  %2652 = vmatprep.subr.bf16.mxu1 %v4526_v55  ;;  %2878 = vmatprep.subr.bf16.mxu0 %v4529_v56  ;;  %v4536_v56 = vld [vmem:[%s6846_s5 + $0x498] ss:$28 sps:$4 sm:$0xff]  }
 0x1e9   :  { %v1013_v17 = vmax.f32 %v827_v6, 0.0  ;;  %v1015_v33 = vmax.f32 %v940_v7, 0.0  ;;  %v4547_v4 = vld [vmem:[%s6846_s5 + $0x4dc] ss:$28 sps:$4 sm:$0xff]  }
 0x1ea   :  { %v5629_v1 = vpack.c.bf16 %v1012_v13, %v1008_v11  ;;  %v5631_v18 = vpack.c.bf16 %v1014_v14, %v1010_v12 }
 0x1eb   :  { %v5633_v19 = vpack.c.bf16 %v1013_v17, %v1009_v15  ;;  %v5635_v20 = vpack.c.bf16 %v1015_v33, %v1011_v16  ;;  %2653 = vmatpush1.bf16.msra.mxu1 %v4524_v8  ;;  %v830_v21 = vpop.f32.mrb[12].mxu1  ;;  %v943_v22 = vpop.f32.mrb[44].mxu0  ;;  %2879 = vmatpush1.bf16.msra.mxu0 %v4527_v9  ;;  %v4545_v15 = vld [vmem:[%s6846_s5 + $0x4d8] ss:$28 sps:$4 sm:$0xff]  }
 0x1ec   :  { %v831_v25 = vadd.f32 %v830_v21, %v5520_v34  ;;  %v944_v27 = vadd.f32 %v943_v22, %v5524_v35  ;;  %v832_v38 = vpop.f32.mrb[13].mxu1  ;;  %v945_v39 = vpop.f32.mrb[45].mxu0  ;;  %2654 = vmatprep.subr.bf16.mxu1 %v4532_v10  ;;  %2880 = vmatprep.subr.bf16.mxu0 %v4535_v32  ;;  %v4542_v32 = vld [vmem:[%s6846_s5 + $0x4d0] ss:$28 sps:$4 sm:$0xff]  }
 0x1ed   :  { %v833_v42 = vadd.f32 %v832_v38, %v5527_v36  ;;  %v946_v47 = vadd.f32 %v945_v39, %v5531_v37  ;;  %v834_v48 = vpop.f32.mrb[14].mxu1  ;;  %v947_v49 = vpop.f32.mrb[46].mxu0  ;;  %2585 = vmatprep.mubr.bf16.mxu1 %v5633_v19  ;;  %2811 = vmatprep.mubr.bf16.mxu0 %v5633_v19  ;;  %v4550_v22 = vld [vmem:[%s6846_s5 + $0x50c] ss:$28 sps:$4 sm:$0xff]  }
 0x1ee   :  { %v835_v50 = vadd.f32 %v834_v48, %v5520_v34  ;;  %v948_v51 = vadd.f32 %v947_v49, %v5524_v35  ;;  %v836_v52 = vpop.f32.mrb[15].mxu1  ;;  %v949_v53 = vpop.f32.mrb[47].mxu0  ;;  %2586 = vmatmul.mubr.bf16.gmra.mrb[40].mxu1 %v5629_v1  ;;  %2812 = vmatmul.mubr.bf16.gmra.mrb[72].mxu0 %v5629_v1  ;;  %v1016_v59 = vmax.f32 %v831_v25, 0.0  ;;  %v1018_v60 = vmax.f32 %v944_v27, 0.0  ;;  %v4548_v49 = vld [vmem:[%s6846_s5 + $0x508] ss:$28 sps:$4 sm:$0xff]  }
 0x1ef   :  { %v837_v54 = vadd.f32 %v836_v52, %v5527_v36  ;;  %v950_v55 = vadd.f32 %v949_v53, %v5531_v37  ;;  %2655 = vmatpush1.bf16.msra.mxu1 %v4530_v23  ;;  %2881 = vmatpush1.bf16.msra.mxu0 %v4533_v24  ;;  %v1017_v5 = vmax.f32 %v833_v42, 0.0  ;;  %v1019_v6 = vmax.f32 %v946_v47, 0.0  ;;  %v4553_v23 = vld [vmem:[%s6846_s5 + $0x514] ss:$28 sps:$4 sm:$0xff]  }
 0x1f0   :  { %v1020_v61 = vmax.f32 %v835_v50, 0.0  ;;  %v1022_v3 = vmax.f32 %v948_v51, 0.0  ;;  %2656 = vmatprep.subr.bf16.mxu1 %v4538_v40  ;;  %2882 = vmatprep.subr.bf16.mxu0 %v4541_v41  ;;  %v4551_v50 = vld [vmem:[%s6846_s5 + $0x510] ss:$28 sps:$4 sm:$0xff]   ;;  %v4556_v51 = vld [vmem:[%s6846_s5 + $0x544] ss:$28 sps:$4 sm:$0xff]  }
 0x1f1   :  { %v1021_v7 = vmax.f32 %v837_v54, 0.0  ;;  %v1023_v8 = vmax.f32 %v950_v55, 0.0 }
 0x1f2   :  { %v5673_v9 = vpack.c.bf16 %v1020_v61, %v1016_v59  ;;  %v5675_v10 = vpack.c.bf16 %v1022_v3, %v1018_v60 }
 0x1f3   :  { %v5677_v11 = vpack.c.bf16 %v1021_v7, %v1017_v5  ;;  %v5679_v12 = vpack.c.bf16 %v1023_v8, %v1019_v6  ;;  %2657 = vmatpush1.bf16.msra.mxu1 %v4536_v56  ;;  %v840_v13 = vpop.f32.mrb[16].mxu1  ;;  %v953_v14 = vpop.f32.mrb[48].mxu0  ;;  %2883 = vmatpush1.bf16.msra.mxu0 %v4539_v57  ;;  %v4559_v56 = vld [vmem:[%s6846_s5 + $0x54c] ss:$28 sps:$4 sm:$0xff]   ;;  %v4554_v8 = vld [vmem:[%s6846_s5 + $0x540] ss:$28 sps:$4 sm:$0xff]  }
 0x1f4   :  { %v841_v16 = vadd.f32 %v840_v13, %v5520_v34  ;;  %v954_v17 = vadd.f32 %v953_v14, %v5524_v35  ;;  %v842_v33 = vpop.f32.mrb[17].mxu1  ;;  %v955_v21 = vpop.f32.mrb[49].mxu0  ;;  %2658 = vmatprep.subr.bf16.mxu1 %v4544_v58  ;;  %2884 = vmatprep.subr.bf16.mxu0 %v4547_v4  ;;  %v4557_v13 = vld [vmem:[%s6846_s5 + $0x548] ss:$28 sps:$4 sm:$0xff]  }
 0x1f5   :  { %v843_v24 = vadd.f32 %v842_v33, %v5527_v36  ;;  %v956_v25 = vadd.f32 %v955_v21, %v5531_v37  ;;  %v844_v27 = vpop.f32.mrb[18].mxu1  ;;  %v957_v38 = vpop.f32.mrb[50].mxu0  ;;  %2595 = vmatprep.mubr.bf16.mxu1 %v5677_v11  ;;  %2821 = vmatprep.mubr.bf16.mxu0 %v5677_v11  ;;  %v4565_v33 = vld [vmem:[%s6846_s5 + $0x584] ss:$28 sps:$4 sm:$0xff]  }
 0x1f6   :  { %v845_v39 = vadd.f32 %v844_v27, %v5520_v34  ;;  %v958_v40 = vadd.f32 %v957_v38, %v5524_v35  ;;  %v846_v41 = vpop.f32.mrb[19].mxu1  ;;  %v959_v42 = vpop.f32.mrb[51].mxu0  ;;  %2596 = vmatmul.mubr.bf16.gmra.mrb[44].mxu1 %v5673_v9  ;;  %2822 = vmatmul.mubr.bf16.gmra.mrb[76].mxu0 %v5673_v9  ;;  %v1024_v52 = vmax.f32 %v841_v16, 0.0  ;;  %v1026_v53 = vmax.f32 %v954_v17, 0.0  ;;  %v4562_v17 = vld [vmem:[%s6846_s5 + $0x57c] ss:$28 sps:$4 sm:$0xff]  }
 0x1f7   :  { %v847_v47 = vadd.f32 %v846_v41, %v5527_v36  ;;  %v960_v48 = vadd.f32 %v959_v42, %v5531_v37  ;;  %2659 = vmatpush1.bf16.msra.mxu1 %v4542_v32  ;;  %2885 = vmatpush1.bf16.msra.mxu0 %v4545_v15  ;;  %v1025_v57 = vmax.f32 %v843_v24, 0.0  ;;  %v1027_v58 = vmax.f32 %v956_v25, 0.0  ;;  %v4560_v42 = vld [vmem:[%s6846_s5 + $0x578] ss:$28 sps:$4 sm:$0xff]  }
 0x1f8   :  { %v1028_v54 = vmax.f32 %v845_v39, 0.0  ;;  %v1030_v55 = vmax.f32 %v958_v40, 0.0  ;;  %2660 = vmatprep.subr.bf16.mxu1 %v4550_v22  ;;  %2886 = vmatprep.subr.bf16.mxu0 %v4553_v23 }
 0x1f9   :  { %v1029_v59 = vmax.f32 %v847_v47, 0.0  ;;  %v1031_v60 = vmax.f32 %v960_v48, 0.0  ;;  %v4563_v47 = vld [vmem:[%s6846_s5 + $0x580] ss:$28 sps:$4 sm:$0xff]   ;;  %v4568_v48 = vld [vmem:[%s6846_s5 + $0x5b4] ss:$28 sps:$4 sm:$0xff]  }
 0x1fa   :  { %v5717_v61 = vpack.c.bf16 %v1028_v54, %v1024_v52  ;;  %v5719_v3 = vpack.c.bf16 %v1030_v55, %v1026_v53  ;;  %v4571_v53 = vld [vmem:[%s6846_s5 + $0x5bc] ss:$28 sps:$4 sm:$0xff]  }
 0x1fb   :  { %v5721_v4 = vpack.c.bf16 %v1029_v59, %v1025_v57  ;;  %v5723_v5 = vpack.c.bf16 %v1031_v60, %v1027_v58  ;;  %2661 = vmatpush1.bf16.msra.mxu1 %v4548_v49  ;;  %v850_v6 = vpop.f32.mrb[20].mxu1  ;;  %v963_v7 = vpop.f32.mrb[52].mxu0  ;;  %2887 = vmatpush1.bf16.msra.mxu0 %v4551_v50 }
 0x1fc   :  { %v851_v14 = vadd.f32 %v850_v6, %v5520_v34  ;;  %v964_v32 = vadd.f32 %v963_v7, %v5524_v35  ;;  %v852_v15 = vpop.f32.mrb[21].mxu1  ;;  %v965_v16 = vpop.f32.mrb[53].mxu0  ;;  %2662 = vmatprep.subr.bf16.mxu1 %v4556_v51  ;;  %2888 = vmatprep.subr.bf16.mxu0 %v4559_v56 }
 0x1fd   :  { %v853_v21 = vadd.f32 %v852_v15, %v5527_v36  ;;  %v966_v22 = vadd.f32 %v965_v16, %v5531_v37  ;;  %v854_v23 = vpop.f32.mrb[22].mxu1  ;;  %v967_v24 = vpop.f32.mrb[54].mxu0  ;;  %2605 = vmatprep.mubr.bf16.mxu1 %v5721_v4  ;;  %2831 = vmatprep.mubr.bf16.mxu0 %v5721_v4 }
 0x1fe   :  { %v855_v25 = vadd.f32 %v854_v23, %v5520_v34  ;;  %v968_v27 = vadd.f32 %v967_v24, %v5524_v35  ;;  %v856_v38 = vpop.f32.mrb[23].mxu1  ;;  %v969_v39 = vpop.f32.mrb[55].mxu0  ;;  %2606 = vmatmul.mubr.bf16.gmra.mrb[48].mxu1 %v5717_v61  ;;  %2832 = vmatmul.mubr.bf16.gmra.mrb[80].mxu0 %v5717_v61  ;;  %v1032_v49 = vmax.f32 %v851_v14, 0.0  ;;  %v1034_v50 = vmax.f32 %v964_v32, 0.0  ;;  %v4569_v14 = vld [vmem:[%s6846_s5 + $0x5b8] ss:$28 sps:$4 sm:$0xff]  }
 0x1ff   :  { %v857_v40 = vadd.f32 %v856_v38, %v5527_v36  ;;  %v970_v41 = vadd.f32 %v969_v39, %v5531_v37  ;;  %2663 = vmatpush1.bf16.msra.mxu1 %v4554_v8  ;;  %2889 = vmatpush1.bf16.msra.mxu0 %v4557_v13  ;;  %v1033_v54 = vmax.f32 %v853_v21, 0.0  ;;  %v1035_v55 = vmax.f32 %v966_v22, 0.0  ;;  %v4566_v13 = vld [vmem:[%s6846_s5 + $0x5b0] ss:$28 sps:$4 sm:$0xff]  }
 0x200   :  { %v1036_v51 = vmax.f32 %v855_v25, 0.0  ;;  %v1038_v52 = vmax.f32 %v968_v27, 0.0  ;;  %2664 = vmatprep.subr.bf16.mxu1 %v4562_v17  ;;  %2890 = vmatprep.subr.bf16.mxu0 %v4565_v33  ;;  %v4574_v33 = vld [vmem:[%s6846_s5 + $0x5ec] ss:$28 sps:$4 sm:$0xff]   ;;  %v4577_v21 = vld [vmem:[%s6846_s5 + $0x5f4] ss:$28 sps:$4 sm:$0xff]  }
 0x201   :  { %v1037_v56 = vmax.f32 %v857_v40, 0.0  ;;  %v1039_v57 = vmax.f32 %v970_v41, 0.0 }
 0x202   :  { %v5761_v58 = vpack.c.bf16 %v1036_v51, %v1032_v49  ;;  %v5763_v59 = vpack.c.bf16 %v1038_v52, %v1034_v50  ;;  %v4580_v49 = vld [vmem:[%s6846_s5 + $0x624] ss:$28 sps:$4 sm:$0xff]  }
 0x203   :  { %v5765_v60 = vpack.c.bf16 %v1037_v56, %v1033_v54  ;;  %v5767_v6 = vpack.c.bf16 %v1039_v57, %v1035_v55  ;;  %2665 = vmatpush1.bf16.msra.mxu1 %v4560_v42  ;;  %v860_v7 = vpop.f32.mrb[24].mxu1  ;;  %v973_v8 = vpop.f32.mrb[56].mxu0  ;;  %2891 = vmatpush1.bf16.msra.mxu0 %v4563_v47  ;;  %v4572_v47 = vld [vmem:[%s6846_s5 + $0x5e8] ss:$28 sps:$4 sm:$0xff]  }
 0x204   :  { %v861_v32 = vadd.f32 %v860_v7, %v5520_v34  ;;  %v974_v15 = vadd.f32 %v973_v8, %v5524_v35  ;;  %v862_v16 = vpop.f32.mrb[25].mxu1  ;;  %v975_v17 = vpop.f32.mrb[57].mxu0  ;;  %2666 = vmatprep.subr.bf16.mxu1 %v4568_v48  ;;  %2892 = vmatprep.subr.bf16.mxu0 %v4571_v53  ;;  %v4575_v48 = vld [vmem:[%s6846_s5 + $0x5f0] ss:$28 sps:$4 sm:$0xff]  }
 0x205   :  { %v863_v22 = vadd.f32 %v862_v16, %v5527_v36  ;;  %v976_v23 = vadd.f32 %v975_v17, %v5531_v37  ;;  %v864_v24 = vpop.f32.mrb[26].mxu1  ;;  %v977_v25 = vpop.f32.mrb[58].mxu0  ;;  %2615 = vmatprep.mubr.bf16.mxu1 %v5765_v60  ;;  %2841 = vmatprep.mubr.bf16.mxu0 %v5765_v60  ;;  %v4583_v54 = vld [vmem:[%s6846_s5 + $0x62c] ss:$28 sps:$4 sm:$0xff]   ;;  %v4578_v17 = vld [vmem:[%s6846_s5 + $0x620] ss:$28 sps:$4 sm:$0xff]  }
 0x206   :  { %v865_v27 = vadd.f32 %v864_v24, %v5520_v34  ;;  %v978_v38 = vadd.f32 %v977_v25, %v5524_v35  ;;  %v866_v39 = vpop.f32.mrb[27].mxu1  ;;  %v979_v40 = vpop.f32.mrb[59].mxu0  ;;  %2616 = vmatmul.mubr.bf16.gmra.mrb[52].mxu1 %v5761_v58  ;;  %2842 = vmatmul.mubr.bf16.gmra.mrb[84].mxu0 %v5761_v58  ;;  %v1040_v50 = vmax.f32 %v861_v32, 0.0  ;;  %v1042_v51 = vmax.f32 %v974_v15, 0.0  ;;  %v4586_v25 = vld [vmem:[%s6846_s5 + $0x65c] ss:$28 sps:$4 sm:$0xff]  }
 0x207   :  { %v867_v41 = vadd.f32 %v866_v39, %v5527_v36  ;;  %v980_v42 = vadd.f32 %v979_v40, %v5531_v37  ;;  %2667 = vmatpush1.bf16.msra.mxu1 %v4566_v13  ;;  %2893 = vmatpush1.bf16.msra.mxu0 %v4569_v14  ;;  %v1041_v55 = vmax.f32 %v863_v22, 0.0  ;;  %v1043_v56 = vmax.f32 %v976_v23, 0.0 }
 0x208   :  { %v1044_v52 = vmax.f32 %v865_v27, 0.0  ;;  %v1046_v53 = vmax.f32 %v978_v38, 0.0  ;;  %2668 = vmatprep.subr.bf16.mxu1 %v4574_v33  ;;  %2894 = vmatprep.subr.bf16.mxu0 %v4577_v21  ;;  %v4581_v33 = vld [vmem:[%s6846_s5 + $0x628] ss:$28 sps:$4 sm:$0xff]  }
 0x209   :  { %v1045_v57 = vmax.f32 %v867_v41, 0.0  ;;  %v1047_v7 = vmax.f32 %v980_v42, 0.0  ;;  %v4589_v27 = vld [vmem:[%s6846_s5 + $0x664] ss:$28 sps:$4 sm:$0xff]  }
 0x20a   :  { %v5805_v8 = vpack.c.bf16 %v1044_v52, %v1040_v50  ;;  %v5807_v13 = vpack.c.bf16 %v1046_v53, %v1042_v51  ;;  %v4584_v52 = vld [vmem:[%s6846_s5 + $0x658] ss:$28 sps:$4 sm:$0xff]  }
 0x20b   :  { %v5809_v14 = vpack.c.bf16 %v1045_v57, %v1041_v55  ;;  %v5811_v32 = vpack.c.bf16 %v1047_v7, %v1043_v56  ;;  %2669 = vmatpush1.bf16.msra.mxu1 %v4572_v47  ;;  %v870_v15 = vpop.f32.mrb[28].mxu1  ;;  %v983_v16 = vpop.f32.mrb[60].mxu0  ;;  %2895 = vmatpush1.bf16.msra.mxu0 %v4575_v48 }
 0x20c   :  { %v871_v21 = vadd.f32 %v870_v15, %v5520_v34  ;;  %v984_v22 = vadd.f32 %v983_v16, %v5524_v35  ;;  %v872_v23 = vpop.f32.mrb[29].mxu1  ;;  %v985_v24 = vpop.f32.mrb[61].mxu0  ;;  %2670 = vmatprep.subr.bf16.mxu1 %v4580_v49  ;;  %2896 = vmatprep.subr.bf16.mxu0 %v4583_v54 }
 0x20d   :  { %v873_v38 = vadd.f32 %v872_v23, %v5527_v36  ;;  %v986_v39 = vadd.f32 %v985_v24, %v5531_v37  ;;  %v874_v40 = vpop.f32.mrb[30].mxu1  ;;  %v987_v41 = vpop.f32.mrb[62].mxu0  ;;  %2625 = vmatprep.mubr.bf16.mxu1 %v5809_v14  ;;  %2851 = vmatprep.mubr.bf16.mxu0 %v5809_v14  ;;  %v4593_v23 = vld [vmem:[%s6846_s5 + $0x698] ss:$28 sps:$4 sm:$0xff]   ;;  %v4598_v24 = vld [vmem:[%s6846_s5 + $0x6cc] ss:$28 sps:$4 sm:$0xff]  }
 0x20e   :  { %v875_v42 = vadd.f32 %v874_v40, %v5520_v34  ;;  %v988_v47 = vadd.f32 %v987_v41, %v5524_v35  ;;  %v876_v48 = vpop.f32.mrb[31].mxu1  ;;  %v989_v49 = vpop.f32.mrb[63].mxu0  ;;  %2626 = vmatmul.mubr.bf16.gmra.mrb[56].mxu1 %v5805_v8  ;;  %2852 = vmatmul.mubr.bf16.gmra.mrb[88].mxu0 %v5805_v8  ;;  %v4587_v34 = vld [vmem:[%s6846_s5 + $0x660] ss:$28 sps:$4 sm:$0xff]   ;;  %v4592_v35 = vld [vmem:[%s6846_s5 + $0x694] ss:$28 sps:$4 sm:$0xff]  }
 0x20f   :  { %v877_v50 = vadd.f32 %v876_v48, %v5527_v36  ;;  %v990_v51 = vadd.f32 %v989_v49, %v5531_v37  ;;  %2671 = vmatpush1.bf16.msra.mxu1 %v4578_v17  ;;  %2897 = vmatpush1.bf16.msra.mxu0 %v4581_v33  ;;  %v1048_v53 = vmax.f32 %v871_v21, 0.0  ;;  %v1050_v54 = vmax.f32 %v984_v22, 0.0  ;;  %v4595_v37 = vld [vmem:[%s6846_s5 + $0x69c] ss:$28 sps:$4 sm:$0xff]   ;;  %v4590_v22 = vld [vmem:[%s6846_s5 + $0x690] ss:$28 sps:$4 sm:$0xff]  }
 0x210   :  { %v1052_v55 = vmax.f32 %v875_v42, 0.0  ;;  %v1054_v36 = vmax.f32 %v988_v47, 0.0  ;;  %2672 = vmatprep.subr.bf16.mxu1 %v4586_v25  ;;  %2898 = vmatprep.subr.bf16.mxu0 %v4589_v27  ;;  %v1049_v56 = vmax.f32 %v873_v38, 0.0  ;;  %v1051_v57 = vmax.f32 %v986_v39, 0.0  ;;  %v4601_v25 = vld [vmem:[%s6846_s5 + $0x6d4] ss:$28 sps:$4 sm:$0xff]  }
 0x211   :  { %v1053_v7 = vmax.f32 %v877_v50, 0.0  ;;  %v1055_v15 = vmax.f32 %v990_v51, 0.0  ;;  %v4596_v27 = vld [vmem:[%s6846_s5 + $0x6c8] ss:$28 sps:$4 sm:$0xff]   ;;  %v4599_v38 = vld [vmem:[%s6846_s5 + $0x6d0] ss:$28 sps:$4 sm:$0xff]  }
 0x212   :  { %v5849_v16 = vpack.c.bf16 %v1052_v55, %v1048_v53  ;;  %v5851_v17 = vpack.c.bf16 %v1054_v36, %v1050_v54  ;;  %v4604_v39 = vld [vmem:[%s6846_s5 + $0x14] ss:$28 sps:$4 sm:$0xff]   ;;  %v4607_v42 = vld [vmem:[%s6846_s5 + $0x4c] ss:$28 sps:$4 sm:$0xff]   ;;  %v4610_v50 = vld [vmem:[%s6846_s5 + $0x84] ss:$28 sps:$4 sm:$0xff]  }
 0x213   :  { %v5853_v33 = vpack.c.bf16 %v1053_v7, %v1049_v56  ;;  %v5855_v21 = vpack.c.bf16 %v1055_v15, %v1051_v57  ;;  %2673 = vmatpush1.bf16.msra.mxu1 %v4584_v52  ;;  %2899 = vmatpush1.bf16.msra.mxu0 %v4587_v34  ;;  %v5887_v40 = vld [vmem:[%s6846_s5 + $0x1d8] ss:$28 sps:$4 sm:$0xff]   ;;  %v4602_v41 = vld [vmem:[%s6846_s5 + $0x10] ss:$28 sps:$4 sm:$0xff]   ;;  %v4605_v49 = vld [vmem:[%s6846_s5 + $0x48] ss:$28 sps:$4 sm:$0xff]  }
 0x214   :  { %2674 = vmatprep.subr.bf16.mxu1 %v4592_v35  ;;  %2900 = vmatprep.subr.bf16.mxu0 %v4595_v37  ;;  %v5899_v47 = vld [vmem:[%s6846_s5 + $0x18] ss:$28 sps:$4 sm:$0xff]   ;;  %v5905_v48 = vld [vmem:[%s6846_s5 + $0x210] ss:$28 sps:$4 sm:$0xff]   ;;  %v5926_v52 = vld [vmem:[%s6846_s5 + $0x248] ss:$28 sps:$4 sm:$0xff]  }
 0x215   :  { %2635 = vmatprep.mubr.bf16.mxu1 %v5853_v33  ;;  %2861 = vmatprep.mubr.bf16.mxu0 %v5853_v33  ;;  %v5920_v51 = vld [vmem:[%s6846_s5 + $0x50] ss:$28 sps:$4 sm:$0xff]   ;;  %v4608_v34 = vld [vmem:[%s6846_s5 + $0x80] ss:$28 sps:$4 sm:$0xff]   ;;  %v5938_v53 = vld [vmem:[%s6846_s5 + $0x88] ss:$28 sps:$4 sm:$0xff]  }
 0x216   :  { %2636 = vmatmul.mubr.bf16.gmra.mrb[60].mxu1 %v5849_v16  ;;  %2862 = vmatmul.mubr.bf16.gmra.mrb[92].mxu0 %v5849_v16  ;;  %v4613_v35 = vld [vmem:[%s6846_s5 + $0xbc] ss:$28 sps:$4 sm:$0xff]   ;;  %v4616_v36 = vld [vmem:[%s6846_s5 + $0xf4] ss:$28 sps:$4 sm:$0xff]   ;;  %v4619_v7 = vld [vmem:[%s6846_s5 + $0x12c] ss:$28 sps:$4 sm:$0xff]  }
 0x217   :  { %2675 = vmatpush1.bf16.msra.mxu1 %v4590_v22  ;;  %2678 = vmatprep.mubr.bf16.mxu1 %v5547_v2  ;;  %v5945_v54 = vld [vmem:[%s6846_s5 + $0x280] ss:$28 sps:$4 sm:$0xff]   ;;  %v4611_v55 = vld [vmem:[%s6846_s5 + $0xb8] ss:$28 sps:$4 sm:$0xff]   ;;  %v4614_v57 = vld [vmem:[%s6846_s5 + $0xf0] ss:$28 sps:$4 sm:$0xff]  }
 0x218   :  { %2901 = vmatpush1.bf16.msra.mxu0 %v4593_v23  ;;  %2904 = vmatprep.mubr.bf16.mxu0 %v5547_v2  ;;  %v5960_v37 = vld [vmem:[%s6846_s5 + $0xc0] ss:$28 sps:$4 sm:$0xff]   ;;  %v5966_v56 = vld [vmem:[%s6846_s5 + $0x2b8] ss:$28 sps:$4 sm:$0xff]   ;;  %v5985_v22 = vld [vmem:[%s6846_s5 + $0x2f0] ss:$28 sps:$4 sm:$0xff]  }
 0x219   :  { %2676 = vmatprep.subr.bf16.mxu1 %v4598_v24  ;;  %2902 = vmatprep.subr.bf16.mxu0 %v4601_v25  ;;  %v5978_v15 = vld [vmem:[%s6846_s5 + $0xf8] ss:$28 sps:$4 sm:$0xff]   ;;  %v4617_v23 = vld [vmem:[%s6846_s5 + $0x128] ss:$28 sps:$4 sm:$0xff]   ;;  %v6000_v25 = vld [vmem:[%s6846_s5 + $0x130] ss:$28 sps:$4 sm:$0xff]  }
 0x21a   :  { %v4622_v24 = vld [vmem:[%s6846_s5 + $0x164] ss:$28 sps:$4 sm:$0xff]  }
 0x21b   :  { %2677 = vmatpush1.bf16.msra.mxu1 %v4596_v27  ;;  %v6006_v27 = vld [vmem:[%s6846_s5 + $0x328] ss:$28 sps:$4 sm:$0xff]  }
 0x21c   :  { %2903 = vmatpush1.bf16.msra.mxu0 %v4599_v38  ;;  %2985 = vmatprep.subr.bf16.mxu1 %v4604_v39  ;;  %v4620_v38 = vld [vmem:[%s6846_s5 + $0x160] ss:$28 sps:$4 sm:$0xff]  }
 0x21d   :  { %3945 = vmatprep.subr.bf16.mxu0 %v5887_v40  ;;  %v4625_v39 = vld [vmem:[%s6846_s5 + $0x19c] ss:$28 sps:$4 sm:$0xff]  }
 0x21e   :  { %2679 = vmatmul.mubr.bf16.vlgmr.msra.gmra.mrb[32].mxu1 %v5543_v63 }
 0x21f   :  { %2905 = vmatmul.mubr.bf16.vlgmr.msra.gmra.mrb[64].mxu0 %v5543_v63  ;;  %2986 = vmatpush1.bf16.msra.mxu1 %v4602_v41  ;;  %v6018_v41 = vld [vmem:[%s6846_s5 + $0x168] ss:$28 sps:$4 sm:$0xff]  }
 0x220   :  { %2688 = vmatprep.mubr.bf16.mxu1 %v5591_v46  ;;  %2914 = vmatprep.mubr.bf16.mxu0 %v5591_v46 }
 0x221   :  { %2987 = vmatprep.subr.bf16.mxu1 %v4607_v42  ;;  %3946 = vmatpush3.bf16.msra.mxu0 %v5899_v47  ;;  %v6025_v42 = vld [vmem:[%s6846_s5 + $0x360] ss:$28 sps:$4 sm:$0xff]  }
 0x222   :  { %3947 = vmatprep.subr.bf16.mxu0 %v5905_v48 }
 0x223   :  { %2988 = vmatpush1.bf16.msra.mxu1 %v4605_v49  ;;  %v4623_v49 = vld [vmem:[%s6846_s5 + $0x198] ss:$28 sps:$4 sm:$0xff]  }
 0x224   :  { %2989 = vmatprep.subr.bf16.mxu1 %v4610_v50  ;;  %v4628_v50 = vld [vmem:[%s6846_s5 + $0x1d4] ss:$28 sps:$4 sm:$0xff]  }
 0x225   :  { %3948 = vmatpush3.bf16.msra.mxu0 %v5920_v51 }
 0x226   :  { %2689 = vmatmul.mubr.bf16.gmra.mrb[36].mxu1 %v5587_v44  ;;  %3949 = vmatprep.subr.bf16.mxu0 %v5926_v52 }
 0x227   :  { %2915 = vmatmul.mubr.bf16.gmra.mrb[68].mxu0 %v5587_v44  ;;  %2990 = vmatpush1.bf16.msra.mxu1 %v4608_v34  ;;  %v6040_v34 = vld [vmem:[%s6846_s5 + $0x1a0] ss:$28 sps:$4 sm:$0xff]  }
 0x228   :  { %2698 = vmatprep.mubr.bf16.mxu1 %v5635_v20  ;;  %2924 = vmatprep.mubr.bf16.mxu0 %v5635_v20 }
 0x229   :  { %2991 = vmatprep.subr.bf16.mxu1 %v4613_v35  ;;  %3950 = vmatpush3.bf16.msra.mxu0 %v5938_v53  ;;  %v4681_v35 = vld [vmem:[%s6846_s5 + $0x558] ss:$28 sps:$4 sm:$0xff]  }
 0x22a   :  { %3951 = vmatprep.subr.bf16.mxu0 %v5945_v54 }
 0x22b   :  { %2992 = vmatpush1.bf16.msra.mxu1 %v4611_v55  ;;  %v4626_v55 = vld [vmem:[%s6846_s5 + $0x1d0] ss:$28 sps:$4 sm:$0xff]  }
 0x22c   :  { %2993 = vmatprep.subr.bf16.mxu1 %v4616_v36  ;;  %v4633_v36 = vld [vmem:[%s6846_s5 + $0x20c] ss:$28 sps:$4 sm:$0xff]  }
 0x22d   :  { %3952 = vmatpush3.bf16.msra.mxu0 %v5960_v37 }
 0x22e   :  { %2699 = vmatmul.mubr.bf16.gmra.mrb[40].mxu1 %v5631_v18  ;;  %3953 = vmatprep.subr.bf16.mxu0 %v5966_v56 }
 0x22f   :  { %2925 = vmatmul.mubr.bf16.gmra.mrb[72].mxu0 %v5631_v18  ;;  %2994 = vmatpush1.bf16.msra.mxu1 %v4614_v57  ;;  %v4631_v57 = vld [vmem:[%s6846_s5 + $0x208] ss:$28 sps:$4 sm:$0xff]  }
 0x230   :  { %2708 = vmatprep.mubr.bf16.mxu1 %v5679_v12  ;;  %2934 = vmatprep.mubr.bf16.mxu0 %v5679_v12 }
 0x231   :  { %2995 = vmatprep.subr.bf16.mxu1 %v4619_v7  ;;  %3954 = vmatpush3.bf16.msra.mxu0 %v5978_v15  ;;  %v4638_v7 = vld [vmem:[%s6846_s5 + $0x244] ss:$28 sps:$4 sm:$0xff]  }
 0x232   :  { %3955 = vmatprep.subr.bf16.mxu0 %v5985_v22 }
 0x233   :  { %2996 = vmatpush1.bf16.msra.mxu1 %v4617_v23  ;;  %v4636_v23 = vld [vmem:[%s6846_s5 + $0x240] ss:$28 sps:$4 sm:$0xff]  }
 0x234   :  { %2997 = vmatprep.subr.bf16.mxu1 %v4622_v24  ;;  %v4643_v24 = vld [vmem:[%s6846_s5 + $0x27c] ss:$28 sps:$4 sm:$0xff]  }
 0x235   :  { %3956 = vmatpush3.bf16.msra.mxu0 %v6000_v25 }
 0x236   :  { %2709 = vmatmul.mubr.bf16.gmra.mrb[44].mxu1 %v5675_v10  ;;  %3957 = vmatprep.subr.bf16.mxu0 %v6006_v27 }
 0x237   :  { %2935 = vmatmul.mubr.bf16.gmra.mrb[76].mxu0 %v5675_v10  ;;  %2998 = vmatpush1.bf16.msra.mxu1 %v4620_v38  ;;  %v4641_v38 = vld [vmem:[%s6846_s5 + $0x278] ss:$28 sps:$4 sm:$0xff]  }
 0x238   :  { %2718 = vmatprep.mubr.bf16.mxu1 %v5723_v5  ;;  %2944 = vmatprep.mubr.bf16.mxu0 %v5723_v5 }
 0x239   :  { %2999 = vmatprep.subr.bf16.mxu1 %v4625_v39  ;;  %3958 = vmatpush3.bf16.msra.mxu0 %v6018_v41  ;;  %v4648_v39 = vld [vmem:[%s6846_s5 + $0x2b4] ss:$28 sps:$4 sm:$0xff]  }
 0x23a   :  { %3959 = vmatprep.subr.bf16.mxu0 %v6025_v42 }
 0x23b   :  { %3000 = vmatpush1.bf16.msra.mxu1 %v4623_v49  ;;  %v4646_v49 = vld [vmem:[%s6846_s5 + $0x2b0] ss:$28 sps:$4 sm:$0xff]  }
 0x23c   :  { %3001 = vmatprep.subr.bf16.mxu1 %v4628_v50  ;;  %v4653_v50 = vld [vmem:[%s6846_s5 + $0x2ec] ss:$28 sps:$4 sm:$0xff]  }
 0x23d   :  { %3960 = vmatpush3.bf16.msra.mxu0 %v6040_v34 }
 0x23e   :  { %2719 = vmatmul.mubr.bf16.gmra.mrb[48].mxu1 %v5719_v3  ;;  %4009 = vmatprep.subr.bf16.mxu0 %v4681_v35  ;;  %v4651_v35 = vld [vmem:[%s6846_s5 + $0x2e8] ss:$28 sps:$4 sm:$0xff]  }
 0x23f   :  { %2945 = vmatmul.mubr.bf16.gmra.mrb[80].mxu0 %v5719_v3  ;;  %3002 = vmatpush1.bf16.msra.mxu1 %v4626_v55  ;;  %v4658_v55 = vld [vmem:[%s6846_s5 + $0x324] ss:$28 sps:$4 sm:$0xff]  }
 0x240   :  { %2728 = vmatprep.mubr.bf16.mxu1 %v5767_v6  ;;  %2954 = vmatprep.mubr.bf16.mxu0 %v5767_v6 }
 0x241   :  { %3003 = vmatprep.subr.bf16.mxu1 %v4633_v36  ;;  %v4656_v36 = vld [vmem:[%s6846_s5 + $0x320] ss:$28 sps:$4 sm:$0xff]  }
 0x243   :  { %3004 = vmatpush1.bf16.msra.mxu1 %v4631_v57  ;;  %v4663_v57 = vld [vmem:[%s6846_s5 + $0x35c] ss:$28 sps:$4 sm:$0xff]  }
 0x244   :  { %3005 = vmatprep.subr.bf16.mxu1 %v4638_v7  ;;  %v4661_v7 = vld [vmem:[%s6846_s5 + $0x358] ss:$28 sps:$4 sm:$0xff]  }
 0x246   :  { %2729 = vmatmul.mubr.bf16.gmra.mrb[52].mxu1 %v5763_v59 }
 0x247   :  { %2955 = vmatmul.mubr.bf16.gmra.mrb[84].mxu0 %v5763_v59  ;;  %3006 = vmatpush1.bf16.msra.mxu1 %v4636_v23  ;;  %v4668_v23 = vld [vmem:[%s6846_s5 + $0x394] ss:$28 sps:$4 sm:$0xff]  }
 0x248   :  { %2738 = vmatprep.mubr.bf16.mxu1 %v5811_v32  ;;  %2964 = vmatprep.mubr.bf16.mxu0 %v5811_v32 }
 0x249   :  { %3007 = vmatprep.subr.bf16.mxu1 %v4643_v24  ;;  %v4666_v24 = vld [vmem:[%s6846_s5 + $0x390] ss:$28 sps:$4 sm:$0xff]  }
 0x24b   :  { %3008 = vmatpush1.bf16.msra.mxu1 %v4641_v38  ;;  %v4671_v38 = vld [vmem:[%s6846_s5 + $0x3cc] ss:$28 sps:$4 sm:$0xff]  }
 0x24c   :  { %3009 = vmatprep.subr.bf16.mxu1 %v4648_v39  ;;  %v4682_v39 = vld [vmem:[%s6846_s5 + $0x398] ss:$28 sps:$4 sm:$0xff]  }
 0x24e   :  { %2739 = vmatmul.mubr.bf16.gmra.mrb[56].mxu1 %v5807_v13 }
 0x24f   :  { %2965 = vmatmul.mubr.bf16.gmra.mrb[88].mxu0 %v5807_v13  ;;  %3010 = vmatpush1.bf16.msra.mxu1 %v4646_v49  ;;  %v4669_v49 = vld [vmem:[%s6846_s5 + $0x3c8] ss:$28 sps:$4 sm:$0xff]  }
 0x250   :  { %2748 = vmatprep.mubr.bf16.mxu1 %v5855_v21  ;;  %2974 = vmatprep.mubr.bf16.mxu0 %v5855_v21 }
 0x251   :  { %3011 = vmatprep.subr.bf16.mxu1 %v4653_v50  ;;  %v4674_v50 = vld [vmem:[%s6846_s5 + $0x404] ss:$28 sps:$4 sm:$0xff]  }
 0x253   :  { %3012 = vmatpush1.bf16.msra.mxu1 %v4651_v35  ;;  %v4687_v35 = vld [vmem:[%s6846_s5 + $0x3d0] ss:$28 sps:$4 sm:$0xff]  }
 0x254   :  { %3013 = vmatprep.subr.bf16.mxu1 %v4658_v55  ;;  %v4677_v55 = vld [vmem:[%s6846_s5 + $0x43c] ss:$28 sps:$4 sm:$0xff]  }
 0x256   :  { %2749 = vmatmul.mubr.bf16.gmra.mrb[60].mxu1 %v5851_v17 }
 0x257   :  { %2975 = vmatmul.mubr.bf16.gmra.mrb[92].mxu0 %v5851_v17  ;;  %3014 = vmatpush1.bf16.msra.mxu1 %v4656_v36  ;;  %v4692_v36 = vld [vmem:[%s6846_s5 + $0x408] ss:$28 sps:$4 sm:$0xff]  }
 0x258   :  { %3017 = vmatprep.mubr.bf16.mxu1 %v5545_v0  ;;  %3243 = vmatprep.mubr.bf16.mxu0 %v5545_v0  ;;  %v4686_v0 = vld [vmem:[%s6846_s5 + $0x590] ss:$28 sps:$4 sm:$0xff]  }
 0x259   :  { %3015 = vmatprep.subr.bf16.mxu1 %v4663_v57  ;;  %v4696_v57 = vld [vmem:[%s6846_s5 + $0x600] ss:$28 sps:$4 sm:$0xff]  }
 0x25b   :  { %3016 = vmatpush1.bf16.msra.mxu1 %v4661_v7  ;;  %v4675_v7 = vld [vmem:[%s6846_s5 + $0x438] ss:$28 sps:$4 sm:$0xff]  }
 0x25c   :  { %3098 = vmatprep.subr.bf16.mxu1 %v4668_v23  ;;  %v4680_v23 = vld [vmem:[%s6846_s5 + $0x474] ss:$28 sps:$4 sm:$0xff]  }
 0x25e   :  { %3018 = vmatmul.mubr.bf16.vlgmr.msra.gmra.mrb[64].mxu1 %v5541_v62 }
 0x25f   :  { %3099 = vmatpush1.bf16.msra.mxu1 %v4666_v24  ;;  %3244 = vmatmul.mubr.bf16.vlgmr.msra.gmra.mrb[96].mxu0 %v5541_v62  ;;  %v4691_v62 = vld [vmem:[%s6846_s5 + $0x5c8] ss:$28 sps:$4 sm:$0xff]   ;;  %v4697_v24 = vld [vmem:[%s6846_s5 + $0x440] ss:$28 sps:$4 sm:$0xff]  }
 0x260   :  { %3027 = vmatprep.mubr.bf16.mxu1 %v5589_v45  ;;  %3251 = vmatprep.mubr.bf16.mxu0 %v5589_v45  ;;  %v4672_v45 = vld [vmem:[%s6846_s5 + $0x400] ss:$28 sps:$4 sm:$0xff]  }
 0x261   :  { %3100 = vmatprep.subr.bf16.mxu1 %v4671_v38  ;;  %4010 = vmatpush3.bf16.msra.mxu0 %v4682_v39  ;;  %v4685_v38 = vld [vmem:[%s6846_s5 + $0x4ac] ss:$28 sps:$4 sm:$0xff]   ;;  %v4702_v39 = vld [vmem:[%s6846_s5 + $0x478] ss:$28 sps:$4 sm:$0xff]  }
 0x262   :  { %4011 = vmatprep.subr.bf16.mxu0 %v4686_v0  ;;  %v4706_v0 = vld [vmem:[%s6846_s5 + $0x670] ss:$28 sps:$4 sm:$0xff]  }
 0x263   :  { %3101 = vmatpush1.bf16.msra.mxu1 %v4669_v49  ;;  %v4683_v49 = vld [vmem:[%s6846_s5 + $0x4a8] ss:$28 sps:$4 sm:$0xff]  }
 0x264   :  { %3102 = vmatprep.subr.bf16.mxu1 %v4674_v50  ;;  %v4690_v50 = vld [vmem:[%s6846_s5 + $0x4e4] ss:$28 sps:$4 sm:$0xff]  }
 0x265   :  { %4012 = vmatpush3.bf16.msra.mxu0 %v4687_v35  ;;  %v4707_v35 = vld [vmem:[%s6846_s5 + $0x4b0] ss:$28 sps:$4 sm:$0xff]  }
 0x266   :  { %3028 = vmatmul.mubr.bf16.gmra.mrb[68].mxu1 %v5585_v43  ;;  %4013 = vmatprep.subr.bf16.mxu0 %v4691_v62  ;;  %v4695_v62 = vld [vmem:[%s6846_s5 + $0x51c] ss:$28 sps:$4 sm:$0xff]  }
 0x267   :  { %3103 = vmatpush1.bf16.msra.mxu1 %v4672_v45  ;;  %3252 = vmatmul.mubr.bf16.gmra.mrb[100].mxu0 %v5585_v43  ;;  %v4701_v43 = vld [vmem:[%s6846_s5 + $0x638] ss:$28 sps:$4 sm:$0xff]   ;;  %v4712_v45 = vld [vmem:[%s6846_s5 + $0x4e8] ss:$28 sps:$4 sm:$0xff]  }
 0x268   :  { %3037 = vmatprep.mubr.bf16.mxu1 %v5633_v19  ;;  %3259 = vmatprep.mubr.bf16.mxu0 %v5633_v19  ;;  %v4678_v19 = vld [vmem:[%s6846_s5 + $0x470] ss:$28 sps:$4 sm:$0xff]  }
 0x269   :  { %3104 = vmatprep.subr.bf16.mxu1 %v4677_v55  ;;  %4014 = vmatpush3.bf16.msra.mxu0 %v4692_v36  ;;  %v4716_v55 = vld [vmem:[%s6846_s5 + $0x6e0] ss:$28 sps:$4 sm:$0xff]   ;;  %v4693_v36 = vld [vmem:[%s6846_s5 + $0x518] ss:$28 sps:$4 sm:$0xff]  }
 0x26a   :  { %4015 = vmatprep.subr.bf16.mxu0 %v4696_v57  ;;  %v4700_v57 = vld [vmem:[%s6846_s5 + $0x554] ss:$28 sps:$4 sm:$0xff]  }
 0x26b   :  { %3105 = vmatpush1.bf16.msra.mxu1 %v4675_v7  ;;  %v4717_v7 = vld [vmem:[%s6846_s5 + $0x520] ss:$28 sps:$4 sm:$0xff]  }
 0x26c   :  { %3106 = vmatprep.subr.bf16.mxu1 %v4680_v23  ;;  %v4703_v23 = vld [vmem:[%s6846_s5 + $0x588] ss:$28 sps:$4 sm:$0xff]  }
 0x26d   :  { %4016 = vmatpush3.bf16.msra.mxu0 %v4697_v24  ;;  %v4710_v24 = vld [vmem:[%s6846_s5 + $0x5c4] ss:$28 sps:$4 sm:$0xff]  }
 0x26e   :  { %3038 = vmatmul.mubr.bf16.gmra.mrb[72].mxu1 %v5629_v1  ;;  %4017 = vmatprep.subr.bf16.mxu0 %v4701_v43  ;;  %v4708_v43 = vld [vmem:[%s6846_s5 + $0x5c0] ss:$28 sps:$4 sm:$0xff]  }
 0x26f   :  { %3107 = vmatpush1.bf16.msra.mxu1 %v4678_v19  ;;  %3260 = vmatmul.mubr.bf16.gmra.mrb[104].mxu0 %v5629_v1  ;;  %v4711_v1 = vld [vmem:[%s6846_s5 + $0x6a8] ss:$28 sps:$4 sm:$0xff]   ;;  %v4720_v19 = vld [vmem:[%s6846_s5 + $0x634] ss:$28 sps:$4 sm:$0xff]  }
 0x270   :  { %3047 = vmatprep.mubr.bf16.mxu1 %v5677_v11  ;;  %3267 = vmatprep.mubr.bf16.mxu0 %v5677_v11  ;;  %v4688_v11 = vld [vmem:[%s6846_s5 + $0x4e0] ss:$28 sps:$4 sm:$0xff]  }
 0x271   :  { %3108 = vmatprep.subr.bf16.mxu1 %v4685_v38  ;;  %4018 = vmatpush3.bf16.msra.mxu0 %v4702_v39  ;;  %v4718_v38 = vld [vmem:[%s6846_s5 + $0x630] ss:$28 sps:$4 sm:$0xff]   ;;  %v4721_v39 = vld [vmem:[%s6846_s5 + $0x668] ss:$28 sps:$4 sm:$0xff]  }
 0x272   :  { %4019 = vmatprep.subr.bf16.mxu0 %v4706_v0  ;;  %v4726_v0 = vld [vmem:[%s6846_s5 + $0x6a4] ss:$28 sps:$4 sm:$0xff]  }
 0x273   :  { %3109 = vmatpush1.bf16.msra.mxu1 %v4683_v49  ;;  %v4724_v49 = vld [vmem:[%s6846_s5 + $0x6a0] ss:$28 sps:$4 sm:$0xff]  }
 0x274   :  { %3110 = vmatprep.subr.bf16.mxu1 %v4690_v50  ;;  %v4729_v50 = vld [vmem:[%s6846_s5 + $0x6dc] ss:$28 sps:$4 sm:$0xff]  }
 0x275   :  { %4020 = vmatpush3.bf16.msra.mxu0 %v4707_v35  ;;  %v4727_v35 = vld [vmem:[%s6846_s5 + $0x6d8] ss:$28 sps:$4 sm:$0xff]  }
 0x276   :  { %3048 = vmatmul.mubr.bf16.gmra.mrb[76].mxu1 %v5673_v9  ;;  %4021 = vmatprep.subr.bf16.mxu0 %v4711_v1 }
 0x277   :  { %3111 = vmatpush1.bf16.msra.mxu1 %v4688_v11  ;;  %3268 = vmatmul.mubr.bf16.gmra.mrb[108].mxu0 %v5673_v9  ;;  %v4698_v9 = vld [vmem:[%s6846_s5 + $0x550] ss:$28 sps:$4 sm:$0xff]  }
 0x278   :  { %3057 = vmatprep.mubr.bf16.mxu1 %v5721_v4  ;;  %3275 = vmatprep.mubr.bf16.mxu0 %v5721_v4  ;;  %v4705_v4 = vld [vmem:[%s6846_s5 + $0x58c] ss:$28 sps:$4 sm:$0xff]  }
 0x279   :  { %3112 = vmatprep.subr.bf16.mxu1 %v4695_v62  ;;  %4022 = vmatpush3.bf16.msra.mxu0 %v4712_v45 }
 0x27a   :  { %4023 = vmatprep.subr.bf16.mxu0 %v4716_v55 }
 0x27b   :  { %3113 = vmatpush1.bf16.msra.mxu1 %v4693_v36 }
 0x27c   :  { %3114 = vmatprep.subr.bf16.mxu1 %v4700_v57 }
 0x27d   :  { %4024 = vmatpush3.bf16.msra.mxu0 %v4717_v7 }
 0x27e   :  { %3058 = vmatmul.mubr.bf16.gmra.mrb[80].mxu1 %v5717_v61 }
 0x27f   :  { %3115 = vmatpush1.bf16.msra.mxu1 %v4698_v9  ;;  %3276 = vmatmul.mubr.bf16.gmra.mrb[112].mxu0 %v5717_v61  ;;  %v4715_v61 = vld [vmem:[%s6846_s5 + $0x5fc] ss:$28 sps:$4 sm:$0xff]  }
 0x280   :  { %3067 = vmatprep.mubr.bf16.mxu1 %v5765_v60  ;;  %3283 = vmatprep.mubr.bf16.mxu0 %v5765_v60  ;;  %v4713_v60 = vld [vmem:[%s6846_s5 + $0x5f8] ss:$28 sps:$4 sm:$0xff]  }
 0x281   :  { %3116 = vmatprep.subr.bf16.mxu1 %v4705_v4 }
 0x283   :  { %3117 = vmatpush1.bf16.msra.mxu1 %v4703_v23 }
 0x284   :  { %3118 = vmatprep.subr.bf16.mxu1 %v4710_v24 }
 0x286   :  { %3068 = vmatmul.mubr.bf16.gmra.mrb[84].mxu1 %v5761_v58 }
 0x287   :  { %3119 = vmatpush1.bf16.msra.mxu1 %v4708_v43  ;;  %3284 = vmatmul.mubr.bf16.gmra.mrb[116].mxu0 %v5761_v58  ;;  %v4723_v58 = vld [vmem:[%s6846_s5 + $0x66c] ss:$28 sps:$4 sm:$0xff]  }
 0x288   :  { %3077 = vmatprep.mubr.bf16.mxu1 %v5809_v14  ;;  %3340 = vmatprep.mubr.bf16.mxu0 %v5547_v2 }
 0x289   :  { %3120 = vmatprep.subr.bf16.mxu1 %v4715_v61 }
 0x28b   :  { %3121 = vmatpush1.bf16.msra.mxu1 %v4713_v60 }
 0x28c   :  { %3122 = vmatprep.subr.bf16.mxu1 %v4720_v19 }
 0x28e   :  { %3078 = vmatmul.mubr.bf16.gmra.mrb[88].mxu1 %v5805_v8 }
 0x28f   :  { %3123 = vmatpush1.bf16.msra.mxu1 %v4718_v38  ;;  %3341 = vmatmul.mubr.bf16.vlgmr.msra.gmra.mrb[120].mxu0 %v5543_v63 }
 0x290   :  { %3087 = vmatprep.mubr.bf16.mxu1 %v5853_v33  ;;  %3348 = vmatprep.mubr.bf16.mxu0 %v5591_v46 }
 0x291   :  { %3124 = vmatprep.subr.bf16.mxu1 %v4723_v58 }
 0x293   :  { %3125 = vmatpush1.bf16.msra.mxu1 %v4721_v39 }
 0x294   :  { %3126 = vmatprep.subr.bf16.mxu1 %v4726_v0 }
 0x296   :  { %3088 = vmatmul.mubr.bf16.gmra.mrb[92].mxu1 %v5849_v16 }
 0x297   :  { %3127 = vmatpush1.bf16.msra.mxu1 %v4724_v49  ;;  %3349 = vmatmul.mubr.bf16.gmra.mrb[124].mxu0 %v5587_v44 }
 0x298   :  { %3130 = vmatprep.mubr.bf16.mxu1 %v5547_v2  ;;  %3356 = vmatprep.mubr.bf16.mxu0 %v5635_v20 }
 0x299   :  { %3128 = vmatprep.subr.bf16.mxu1 %v4729_v50 }
 0x29b   :  { %3129 = vmatpush1.bf16.msra.mxu1 %v4727_v35 }
 0x29c   :  { %4073 = vmatprep.subr.bf16.mxu1 %v5887_v40 }
 0x29e   :  { %3131 = vmatmul.mubr.bf16.vlgmr.msra.gmra.mrb[64].mxu1 %v5543_v63  ;;  %v6330_v63 = vld [vmem:[%s6849_s6] sm:$0xff] }
 0x29f   :  { %4081 = vmatpush3.bf16.msra.mxu1 %v5899_v47  ;;  %3357 = vmatmul.mubr.bf16.gmra.mrb[128].mxu0 %v5631_v18  ;;  %v6334_v2 = vrot.slane %v6330_v63, %v5279_v30 }
 0x2a0   :  { %3140 = vmatprep.mubr.bf16.mxu1 %v5591_v46  ;;  %3364 = vmatprep.mubr.bf16.mxu0 %v5679_v12  ;;  %v6343_v46 = vrot.slane %v6330_v63, %v5282_v31 }
 0x2a1   :  { %4074 = vmatprep.subr.bf16.mxu1 %v5905_v48 }
 0x2a3   :  { %4082 = vmatpush3.bf16.msra.mxu1 %v5920_v51 }
 0x2a4   :  { %4075 = vmatprep.subr.bf16.mxu1 %v5926_v52 }
 0x2a6   :  { %3141 = vmatmul.mubr.bf16.gmra.mrb[68].mxu1 %v5587_v44  ;;  %v6339_v44 = vrot.slane %v6330_v63, %v436_v26 }
 0x2a7   :  { %3365 = vmatmul.mubr.bf16.gmra.mrb[132].mxu0 %v5675_v10  ;;  %3150 = vmatprep.mubr.bf16.mxu1 %v5635_v20 }
 0x2a8   :  { %3372 = vmatprep.mubr.bf16.mxu0 %v5723_v5  ;;  %4083 = vmatpush3.bf16.msra.mxu1 %v5938_v53 }
 0x2a9   :  { %4076 = vmatprep.subr.bf16.mxu1 %v5945_v54 }
 0x2ac   :  { %4084 = vmatpush3.bf16.msra.mxu1 %v5960_v37 }
 0x2ad   :  { %4077 = vmatprep.subr.bf16.mxu1 %v5966_v56 }
 0x2ae   :  { %3151 = vmatmul.mubr.bf16.gmra.mrb[72].mxu1 %v5631_v18  ;;  %v6348_v18 = vrot.slane %v6330_v63, %v440_v29 }
 0x2af   :  { %3373 = vmatmul.mubr.bf16.gmra.mrb[136].mxu0 %v5719_v3  ;;  %3160 = vmatprep.mubr.bf16.mxu1 %v5679_v12 }
 0x2b0   :  { %3380 = vmatprep.mubr.bf16.mxu0 %v5767_v6  ;;  %4085 = vmatpush3.bf16.msra.mxu1 %v5978_v15 }
 0x2b1   :  { %4078 = vmatprep.subr.bf16.mxu1 %v5985_v22 }
 0x2b4   :  { %4086 = vmatpush3.bf16.msra.mxu1 %v6000_v25 }
 0x2b5   :  { %4079 = vmatprep.subr.bf16.mxu1 %v6006_v27 }
 0x2b6   :  { %3161 = vmatmul.mubr.bf16.gmra.mrb[76].mxu1 %v5675_v10 }
 0x2b7   :  { %3381 = vmatmul.mubr.bf16.gmra.mrb[140].mxu0 %v5763_v59  ;;  %3170 = vmatprep.mubr.bf16.mxu1 %v5723_v5 }
 0x2b8   :  { %3388 = vmatprep.mubr.bf16.mxu0 %v5811_v32  ;;  %4087 = vmatpush3.bf16.msra.mxu1 %v6018_v41 }
 0x2b9   :  { %4080 = vmatprep.subr.bf16.mxu1 %v6025_v42 }
 0x2bc   :  { %4088 = vmatpush3.bf16.msra.mxu1 %v6040_v34 }
 0x2be   :  { %3171 = vmatmul.mubr.bf16.gmra.mrb[80].mxu1 %v5719_v3 }
 0x2bf   :  { %3389 = vmatmul.mubr.bf16.gmra.mrb[144].mxu0 %v5807_v13  ;;  %3180 = vmatprep.mubr.bf16.mxu1 %v5767_v6 }
 0x2c0   :  { %3396 = vmatprep.mubr.bf16.mxu0 %v5855_v21 }
 0x2c6   :  { %3181 = vmatmul.mubr.bf16.gmra.mrb[84].mxu1 %v5763_v59 }
 0x2c7   :  { %3397 = vmatmul.mubr.bf16.gmra.mrb[148].mxu0 %v5851_v17  ;;  %3190 = vmatprep.mubr.bf16.mxu1 %v5811_v32 }
 0x2ce   :  { %3191 = vmatmul.mubr.bf16.gmra.mrb[88].mxu1 %v5807_v13 }
 0x2cf   :  { %3200 = vmatprep.mubr.bf16.mxu1 %v5855_v21 }
 0x2d6   :  { %3201 = vmatmul.mubr.bf16.gmra.mrb[92].mxu1 %v5851_v17 }
 0x2d7   :  { %3291 = vmatprep.mubr.bf16.mxu1 %v5809_v14 }
 0x2de   :  { %3292 = vmatmul.mubr.bf16.vlgmr.msra.gmra.mrb[96].mxu1 %v5805_v8 }
 0x2df   :  { %3299 = vmatprep.mubr.bf16.mxu1 %v5853_v33 }
 0x2e6   :  { %3300 = vmatmul.mubr.bf16.gmra.mrb[100].mxu1 %v5849_v16 }
 0x2f1   :  { %v2680_v20 = vpop.f32.mrb[32].mxu1 }
 0x2f2   :  { %v4089_v10 = vadd.f32 %v2680_v20, %v6334_v2  ;;  %v2906_v12 = vpop.f32.mrb[64].mxu0  ;;  %v2682_v30 = vpop.f32.mrb[33].mxu1 }
 0x2f3   :  { %v4121_v3 = vadd.f32 %v2906_v12, %v6339_v44  ;;  %v4090_v5 = vadd.f32 %v2682_v30, %v6343_v46  ;;  %v2908_v26 = vpop.f32.mrb[65].mxu0  ;;  %v2684_v59 = vpop.f32.mrb[34].mxu1 }
 0x2f4   :  { %4730 = vtanh.f32 %v4089_v10  ;;  %v4122_v31 = vadd.f32 %v2908_v26, %v6348_v18  ;;  %v4091_v6 = vadd.f32 %v2684_v59, %v6334_v2  ;;  %v2910_v8 = vpop.f32.mrb[66].mxu0  ;;  %v2686_v13 = vpop.f32.mrb[35].mxu1 }
 0x2f5   :  { %4732 = vtanh.f32 %v4121_v3  ;;  %v4123_v29 = vadd.f32 %v2910_v8, %v6339_v44  ;;  %v2912_v14 = vpop.f32.mrb[67].mxu0  ;;  %v4092_v32 = vadd.f32 %v2686_v13, %v6343_v46 }
 0x2f6   :  { %4734 = vtanh.f32 %v4090_v5  ;;  %v4124_v16 = vadd.f32 %v2912_v14, %v6348_v18 }
 0x2f7   :  { %4736 = vtanh.f32 %v4122_v31 }
 0x2f8   :  { %4738 = vtanh.f32 %v4091_v6 }
 0x2f9   :  { %4740 = vtanh.f32 %v4123_v29  ;;  %v2690_v17 = vpop.f32.mrb[36].mxu1 }
 0x2fa   :  { %4742 = vtanh.f32 %v4092_v32  ;;  %v4093_v33 = vadd.f32 %v2690_v17, %v6334_v2  ;;  %v2916_v21 = vpop.f32.mrb[68].mxu0  ;;  %v2692_v40 = vpop.f32.mrb[37].mxu1 }
 0x2fb   :  { %4744 = vtanh.f32 %v4124_v16  ;;  %v4125_v47 = vadd.f32 %v2916_v21, %v6339_v44  ;;  %v4094_v48 = vadd.f32 %v2692_v40, %v6343_v46  ;;  %v2918_v51 = vpop.f32.mrb[69].mxu0  ;;  %v2694_v52 = vpop.f32.mrb[38].mxu1 }
 0x2fc   :  { %4746 = vtanh.f32 %v4093_v33  ;;  %v4126_v53 = vadd.f32 %v2918_v51, %v6348_v18  ;;  %v4095_v54 = vadd.f32 %v2694_v52, %v6334_v2  ;;  %v2920_v37 = vpop.f32.mrb[70].mxu0  ;;  %v2696_v56 = vpop.f32.mrb[39].mxu1 }
 0x2fd   :  { %4748 = vtanh.f32 %v4125_v47  ;;  %v4127_v15 = vadd.f32 %v2920_v37, %v6339_v44  ;;  %v2922_v22 = vpop.f32.mrb[71].mxu0  ;;  %v4096_v27 = vadd.f32 %v2696_v56, %v6343_v46 }
 0x2fe   :  { %v4731_v25 = vpop.eup %4730  ;;  %4750 = vtanh.f32 %v4094_v48  ;;  %v4128_v42 = vadd.f32 %v2922_v22, %v6348_v18 }
 0x2ff   :  { %v4733_v41 = vpop.eup %4732  ;;  %3517 = vst [vmem:[%s6850_s7] sm:$0xff] %v4731_v25  ;;  %4752 = vtanh.f32 %v4126_v53 }
 0x300   :  { %v4735_v34 = vpop.eup %4734  ;;  %3519 = vst [vmem:[%s6850_s7 + $0x10] sm:$0xff] %v4733_v41  ;;  %4754 = vtanh.f32 %v4095_v54 }
 0x301   :  { %v4737_v1 = vpop.eup %4736  ;;  %3518 = vst [vmem:[%s6850_s7 + $0x8] sm:$0xff] %v4735_v34  ;;  %4756 = vtanh.f32 %v4127_v15  ;;  %v2700_v11 = vpop.f32.mrb[40].mxu1 }
 0x302   :  { %v4739_v62 = vpop.eup %4738  ;;  %3520 = vst [vmem:[%s6850_s7 + $0x18] sm:$0xff] %v4737_v1  ;;  %4758 = vtanh.f32 %v4096_v27  ;;  %v4097_v45 = vadd.f32 %v2700_v11, %v6334_v2  ;;  %v2926_v55 = vpop.f32.mrb[72].mxu0 }
 0x303   :  { %v2702_v36 = vpop.f32.mrb[41].mxu1  ;;  %v4741_v57 = vpop.eup %4740  ;;  %3524 = vst [vmem:[%s6850_s7 + $0x38] sm:$0xff] %v4739_v62  ;;  %4760 = vtanh.f32 %v4128_v42  ;;  %v4129_v7 = vadd.f32 %v2926_v55, %v6339_v44 }
 0x304   :  { %v4098_v9 = vadd.f32 %v2702_v36, %v6343_v46  ;;  %v2928_v4 = vpop.f32.mrb[73].mxu0  ;;  %v2704_v23 = vpop.f32.mrb[42].mxu1  ;;  %3526 = vst [vmem:[%s6850_s7 + $0x48] sm:$0xff] %v4741_v57  ;;  %4762 = vtanh.f32 %v4097_v45 }
 0x305   :  { %v4743_v24 = vpop.eup %4742  ;;  %v4130_v43 = vadd.f32 %v2928_v4, %v6348_v18  ;;  %v4099_v61 = vadd.f32 %v2704_v23, %v6334_v2  ;;  %v2930_v60 = vpop.f32.mrb[74].mxu0  ;;  %4764 = vtanh.f32 %v4129_v7 }
 0x306   :  { %v2706_v19 = vpop.f32.mrb[43].mxu1  ;;  %v4745_v38 = vpop.eup %4744  ;;  %3525 = vst [vmem:[%s6850_s7 + $0x40] sm:$0xff] %v4743_v24  ;;  %v4131_v58 = vadd.f32 %v2930_v60, %v6339_v44  ;;  %4766 = vtanh.f32 %v4098_v9 }
 0x307   :  { %v2932_v39 = vpop.f32.mrb[75].mxu0  ;;  %v4747_v0 = vpop.eup %4746  ;;  %3527 = vst [vmem:[%s6850_s7 + $0x50] sm:$0xff] %v4745_v38  ;;  %v4100_v49 = vadd.f32 %v2706_v19, %v6343_v46  ;;  %4768 = vtanh.f32 %v4130_v43 }
 0x308   :  { %v4749_v50 = vpop.eup %4748  ;;  %3531 = vst [vmem:[%s6850_s7 + $0x70] sm:$0xff] %v4747_v0  ;;  %v4132_v35 = vadd.f32 %v2932_v39, %v6348_v18  ;;  %4770 = vtanh.f32 %v4099_v61 }
 0x309   :  { %v4751_v20 = vpop.eup %4750  ;;  %3533 = vst [vmem:[%s6850_s7 + $0x80] sm:$0xff] %v4749_v50  ;;  %4772 = vtanh.f32 %v4131_v58  ;;  %v2710_v12 = vpop.f32.mrb[44].mxu1 }
 0x30a   :  { %v4753_v10 = vpop.eup %4752  ;;  %3532 = vst [vmem:[%s6850_s7 + $0x78] sm:$0xff] %v4751_v20  ;;  %4774 = vtanh.f32 %v4100_v49  ;;  %v4101_v3 = vadd.f32 %v2710_v12, %v6334_v2  ;;  %v2936_v5 = vpop.f32.mrb[76].mxu0 }
 0x30b   :  { %v4755_v30 = vpop.eup %4754  ;;  %3534 = vst [vmem:[%s6850_s7 + $0x88] sm:$0xff] %v4753_v10  ;;  %v2712_v26 = vpop.f32.mrb[45].mxu1  ;;  %4776 = vtanh.f32 %v4132_v35  ;;  %v4133_v31 = vadd.f32 %v2936_v5, %v6339_v44 }
 0x30c   :  { %v4757_v59 = vpop.eup %4756  ;;  %3538 = vst [vmem:[%s6850_s7 + $0xa8] sm:$0xff] %v4755_v30  ;;  %v4102_v6 = vadd.f32 %v2712_v26, %v6343_v46  ;;  %v2938_v8 = vpop.f32.mrb[77].mxu0  ;;  %4778 = vtanh.f32 %v4101_v3 }
 0x30d   :  { %v2714_v13 = vpop.f32.mrb[46].mxu1  ;;  %v4759_v29 = vpop.eup %4758  ;;  %3540 = vst [vmem:[%s6850_s7 + $0xb8] sm:$0xff] %v4757_v59  ;;  %v4134_v14 = vadd.f32 %v2938_v8, %v6348_v18  ;;  %4780 = vtanh.f32 %v4133_v31 }
 0x30e   :  { %v4103_v32 = vadd.f32 %v2714_v13, %v6334_v2  ;;  %v2940_v16 = vpop.f32.mrb[78].mxu0  ;;  %v2716_v17 = vpop.f32.mrb[47].mxu1  ;;  %3539 = vst [vmem:[%s6850_s7 + $0xb0] sm:$0xff] %v4759_v29  ;;  %4782 = vtanh.f32 %v4102_v6 }
 0x30f   :  { %v4761_v33 = vpop.eup %4760  ;;  %v4135_v21 = vadd.f32 %v2940_v16, %v6339_v44  ;;  %v2942_v40 = vpop.f32.mrb[79].mxu0  ;;  %v4104_v48 = vadd.f32 %v2716_v17, %v6343_v46  ;;  %4784 = vtanh.f32 %v4134_v14 }
 0x310   :  { %v4763_v47 = vpop.eup %4762  ;;  %3541 = vst [vmem:[%s6850_s7 + $0xc0] sm:$0xff] %v4761_v33  ;;  %v4136_v52 = vadd.f32 %v2942_v40, %v6348_v18  ;;  %4786 = vtanh.f32 %v4103_v32 }
 0x311   :  { %v4765_v51 = vpop.eup %4764  ;;  %3545 = vst [vmem:[%s6850_s7 + $0xe0] sm:$0xff] %v4763_v47  ;;  %4788 = vtanh.f32 %v4135_v21  ;;  %v2720_v37 = vpop.f32.mrb[48].mxu1 }
 0x312   :  { %v4767_v53 = vpop.eup %4766  ;;  %3547 = vst [vmem:[%s6850_s7 + $0xf0] sm:$0xff] %v4765_v51  ;;  %4790 = vtanh.f32 %v4104_v48  ;;  %v4105_v15 = vadd.f32 %v2720_v37, %v6334_v2  ;;  %v2946_v22 = vpop.f32.mrb[80].mxu0 }
 0x313   :  { %v4769_v54 = vpop.eup %4768  ;;  %3546 = vst [vmem:[%s6850_s7 + $0xe8] sm:$0xff] %v4767_v53  ;;  %v2722_v25 = vpop.f32.mrb[49].mxu1  ;;  %4792 = vtanh.f32 %v4136_v52  ;;  %v4137_v41 = vadd.f32 %v2946_v22, %v6339_v44 }
 0x314   :  { %v4771_v56 = vpop.eup %4770  ;;  %3548 = vst [vmem:[%s6850_s7 + $0xf8] sm:$0xff] %v4769_v54  ;;  %v4106_v42 = vadd.f32 %v2722_v25, %v6343_v46  ;;  %v2948_v34 = vpop.f32.mrb[81].mxu0  ;;  %4794 = vtanh.f32 %v4105_v15 }
 0x315   :  { %v4773_v27 = vpop.eup %4772  ;;  %3552 = vst [vmem:[%s6850_s7 + $0x118] sm:$0xff] %v4771_v56  ;;  %v2724_v1 = vpop.f32.mrb[50].mxu1  ;;  %v4138_v62 = vadd.f32 %v2948_v34, %v6348_v18  ;;  %4796 = vtanh.f32 %v4137_v41 }
 0x316   :  { %v4775_v11 = vpop.eup %4774  ;;  %3554 = vst [vmem:[%s6850_s7 + $0x128] sm:$0xff] %v4773_v27  ;;  %v4107_v45 = vadd.f32 %v2724_v1, %v6334_v2  ;;  %v2950_v55 = vpop.f32.mrb[82].mxu0  ;;  %4798 = vtanh.f32 %v4106_v42 }
 0x317   :  { %v2726_v36 = vpop.f32.mrb[51].mxu1  ;;  %v4777_v57 = vpop.eup %4776  ;;  %3553 = vst [vmem:[%s6850_s7 + $0x120] sm:$0xff] %v4775_v11  ;;  %v4139_v7 = vadd.f32 %v2950_v55, %v6339_v44  ;;  %4800 = vtanh.f32 %v4138_v62 }
 0x318   :  { %v2952_v9 = vpop.f32.mrb[83].mxu0  ;;  %v4779_v4 = vpop.eup %4778  ;;  %3555 = vst [vmem:[%s6850_s7 + $0x130] sm:$0xff] %v4777_v57  ;;  %v4108_v23 = vadd.f32 %v2726_v36, %v6343_v46  ;;  %4802 = vtanh.f32 %v4107_v45 }
 0x319   :  { %v4781_v24 = vpop.eup %4780  ;;  %3559 = vst [vmem:[%s6850_s7 + $0x150] sm:$0xff] %v4779_v4  ;;  %v4140_v43 = vadd.f32 %v2952_v9, %v6348_v18  ;;  %4804 = vtanh.f32 %v4139_v7  ;;  %v2730_v19 = vpop.f32.mrb[52].mxu1 }
 0x31a   :  { %v4783_v61 = vpop.eup %4782  ;;  %3561 = vst [vmem:[%s6850_s7 + $0x160] sm:$0xff] %v4781_v24  ;;  %4806 = vtanh.f32 %v4108_v23  ;;  %v4109_v58 = vadd.f32 %v2730_v19, %v6334_v2  ;;  %v2956_v39 = vpop.f32.mrb[84].mxu0 }
 0x31b   :  { %v4785_v60 = vpop.eup %4784  ;;  %3560 = vst [vmem:[%s6850_s7 + $0x158] sm:$0xff] %v4783_v61  ;;  %v2732_v0 = vpop.f32.mrb[53].mxu1  ;;  %4808 = vtanh.f32 %v4140_v43  ;;  %v4141_v50 = vadd.f32 %v2956_v39, %v6339_v44 }
 0x31c   :  { %v4787_v38 = vpop.eup %4786  ;;  %3562 = vst [vmem:[%s6850_s7 + $0x168] sm:$0xff] %v4785_v60  ;;  %v4110_v35 = vadd.f32 %v2732_v0, %v6343_v46  ;;  %v2958_v20 = vpop.f32.mrb[85].mxu0  ;;  %4810 = vtanh.f32 %v4109_v58 }
 0x31d   :  { %v4789_v49 = vpop.eup %4788  ;;  %3566 = vst [vmem:[%s6850_s7 + $0x188] sm:$0xff] %v4787_v38  ;;  %v2734_v10 = vpop.f32.mrb[54].mxu1  ;;  %v4142_v30 = vadd.f32 %v2958_v20, %v6348_v18  ;;  %4812 = vtanh.f32 %v4141_v50 }
 0x31e   :  { %v4791_v12 = vpop.eup %4790  ;;  %3568 = vst [vmem:[%s6850_s7 + $0x198] sm:$0xff] %v4789_v49  ;;  %v4111_v3 = vadd.f32 %v2734_v10, %v6334_v2  ;;  %v2960_v5 = vpop.f32.mrb[86].mxu0  ;;  %4814 = vtanh.f32 %v4110_v35 }
 0x31f   :  { %v2736_v26 = vpop.f32.mrb[55].mxu1  ;;  %v4793_v59 = vpop.eup %4792  ;;  %3567 = vst [vmem:[%s6850_s7 + $0x190] sm:$0xff] %v4791_v12  ;;  %v4143_v31 = vadd.f32 %v2960_v5, %v6339_v44  ;;  %4816 = vtanh.f32 %v4142_v30 }
 0x320   :  { %v2962_v6 = vpop.f32.mrb[87].mxu0  ;;  %v4795_v8 = vpop.eup %4794  ;;  %3569 = vst [vmem:[%s6850_s7 + $0x1a0] sm:$0xff] %v4793_v59  ;;  %v4112_v13 = vadd.f32 %v2736_v26, %v6343_v46  ;;  %4818 = vtanh.f32 %v4111_v3 }
 0x321   :  { %v4797_v29 = vpop.eup %4796  ;;  %3573 = vst [vmem:[%s6850_s7 + $0x1c0] sm:$0xff] %v4795_v8  ;;  %v4144_v14 = vadd.f32 %v2962_v6, %v6348_v18  ;;  %4820 = vtanh.f32 %v4143_v31  ;;  %v2740_v17 = vpop.f32.mrb[56].mxu1 }
 0x322   :  { %v4799_v32 = vpop.eup %4798  ;;  %3575 = vst [vmem:[%s6850_s7 + $0x1d0] sm:$0xff] %v4797_v29  ;;  %4822 = vtanh.f32 %v4112_v13  ;;  %v4113_v21 = vadd.f32 %v2740_v17, %v6334_v2  ;;  %v2966_v40 = vpop.f32.mrb[88].mxu0 }
 0x323   :  { %v4801_v16 = vpop.eup %4800  ;;  %3574 = vst [vmem:[%s6850_s7 + $0x1c8] sm:$0xff] %v4799_v32  ;;  %v2742_v47 = vpop.f32.mrb[57].mxu1  ;;  %4824 = vtanh.f32 %v4144_v14  ;;  %v4145_v51 = vadd.f32 %v2966_v40, %v6339_v44 }
 0x324   :  { %v4803_v33 = vpop.eup %4802  ;;  %3576 = vst [vmem:[%s6850_s7 + $0x1d8] sm:$0xff] %v4801_v16  ;;  %v4114_v52 = vadd.f32 %v2742_v47, %v6343_v46  ;;  %v2968_v53 = vpop.f32.mrb[89].mxu0  ;;  %4826 = vtanh.f32 %v4113_v21 }
 0x325   :  { %v4805_v48 = vpop.eup %4804  ;;  %3580 = vst [vmem:[%s6850_s7 + $0x1f8] sm:$0xff] %v4803_v33  ;;  %v2744_v54 = vpop.f32.mrb[58].mxu1  ;;  %v4146_v56 = vadd.f32 %v2968_v53, %v6348_v18  ;;  %4828 = vtanh.f32 %v4145_v51 }
 0x326   :  { %v4807_v37 = vpop.eup %4806  ;;  %3582 = vst [vmem:[%s6850_s7 + $0x208] sm:$0xff] %v4805_v48  ;;  %v4115_v15 = vadd.f32 %v2744_v54, %v6334_v2  ;;  %v2970_v22 = vpop.f32.mrb[90].mxu0  ;;  %4830 = vtanh.f32 %v4114_v52 }
 0x327   :  { %v2746_v25 = vpop.f32.mrb[59].mxu1  ;;  %v4809_v27 = vpop.eup %4808  ;;  %3581 = vst [vmem:[%s6850_s7 + $0x200] sm:$0xff] %v4807_v37  ;;  %v4147_v41 = vadd.f32 %v2970_v22, %v6339_v44  ;;  %4832 = vtanh.f32 %v4146_v56 }
 0x328   :  { %v2972_v42 = vpop.f32.mrb[91].mxu0  ;;  %v4811_v34 = vpop.eup %4810  ;;  %3583 = vst [vmem:[%s6850_s7 + $0x210] sm:$0xff] %v4809_v27  ;;  %v4116_v1 = vadd.f32 %v2746_v25, %v6343_v46  ;;  %4834 = vtanh.f32 %v4115_v15 }
 0x329   :  { %v4813_v11 = vpop.eup %4812  ;;  %3587 = vst [vmem:[%s6850_s7 + $0x230] sm:$0xff] %v4811_v34  ;;  %v4148_v62 = vadd.f32 %v2972_v42, %v6348_v18  ;;  %4836 = vtanh.f32 %v4147_v41  ;;  %v2750_v36 = vpop.f32.mrb[60].mxu1 }
 0x32a   :  { %v4815_v45 = vpop.eup %4814  ;;  %3589 = vst [vmem:[%s6850_s7 + $0x240] sm:$0xff] %v4813_v11  ;;  %4838 = vtanh.f32 %v4116_v1  ;;  %v4117_v7 = vadd.f32 %v2750_v36, %v6334_v2  ;;  %v2976_v9 = vpop.f32.mrb[92].mxu0 }
 0x32b   :  { %v4817_v55 = vpop.eup %4816  ;;  %3588 = vst [vmem:[%s6850_s7 + $0x238] sm:$0xff] %v4815_v45  ;;  %v2752_v4 = vpop.f32.mrb[61].mxu1  ;;  %4840 = vtanh.f32 %v4148_v62  ;;  %v4149_v24 = vadd.f32 %v2976_v9, %v6339_v44 }
 0x32c   :  { %v4819_v57 = vpop.eup %4818  ;;  %3590 = vst [vmem:[%s6850_s7 + $0x248] sm:$0xff] %v4817_v55  ;;  %v4118_v43 = vadd.f32 %v2752_v4, %v6343_v46  ;;  %v2978_v61 = vpop.f32.mrb[93].mxu0  ;;  %4842 = vtanh.f32 %v4117_v7 }
 0x32d   :  { %v4821_v23 = vpop.eup %4820  ;;  %3594 = vst [vmem:[%s6850_s7 + $0x268] sm:$0xff] %v4819_v57  ;;  %v2754_v60 = vpop.f32.mrb[62].mxu1  ;;  %v4150_v38 = vadd.f32 %v2978_v61, %v6348_v18  ;;  %4844 = vtanh.f32 %v4149_v24  ;;  %v1372_v24 = vsub.s32 6, %v5273_v28 }
 0x32e   :  { %v4823_v19 = vpop.eup %4822  ;;  %3596 = vst [vmem:[%s6850_s7 + $0x278] sm:$0xff] %v4821_v23  ;;  %v4119_v58 = vadd.f32 %v2754_v60, %v6334_v2  ;;  %v2980_v39 = vpop.f32.mrb[94].mxu0  ;;  %4846 = vtanh.f32 %v4118_v43 }
 0x32f   :  { %v2756_v0 = vpop.f32.mrb[63].mxu1  ;;  %v4825_v49 = vpop.eup %4824  ;;  %3595 = vst [vmem:[%s6850_s7 + $0x270] sm:$0xff] %v4823_v19  ;;  %v4151_v50 = vadd.f32 %v2980_v39, %v6339_v44  ;;  %4848 = vtanh.f32 %v4150_v38  ;;  %v6622_v38 = vrot.slane %v6330_v63, %v1372_v24 }
 0x330   :  { %v2982_v35 = vpop.f32.mrb[95].mxu0  ;;  %v4827_v20 = vpop.eup %4826  ;;  %3597 = vst [vmem:[%s6850_s7 + $0x280] sm:$0xff] %v4825_v49  ;;  %v4120_v10 = vadd.f32 %v2756_v0, %v6343_v46  ;;  %4850 = vtanh.f32 %v4119_v58 }
 0x331   :  { %v4829_v2 = vpop.eup %4828  ;;  %3601 = vst [vmem:[%s6850_s7 + $0x2a0] sm:$0xff] %v4827_v20  ;;  %v4152_v12 = vadd.f32 %v2982_v35, %v6348_v18  ;;  %4852 = vtanh.f32 %v4151_v50 }
 0x332   :  { %v4831_v30 = vpop.eup %4830  ;;  %3603 = vst [vmem:[%s6850_s7 + $0x2b0] sm:$0xff] %v4829_v2  ;;  %4854 = vtanh.f32 %v4120_v10  ;;  %v3961_v3 = vpop.f32.mrb[96].mxu0 }
 0x333   :  { %v4833_v44 = vpop.eup %4832  ;;  %3602 = vst [vmem:[%s6850_s7 + $0x2a8] sm:$0xff] %v4831_v30  ;;  %4856 = vtanh.f32 %v4152_v12  ;;  %v3962_v5 = vpop.f32.mrb[97].mxu0 }
 0x334   :  { %v4835_v46 = vpop.eup %4834  ;;  %3604 = vst [vmem:[%s6850_s7 + $0x2b8] sm:$0xff] %v4833_v44  ;;  %v3963_v59 = vadd.f32 %v3962_v5, %v3961_v3  ;;  %v3964_v31 = vpop.f32.mrb[98].mxu0  ;;  %v1364_v44 = vsub.s32 4, %v5273_v28  ;;  %v1368_v3 = vsub.s32 5, %v5273_v28 }
 0x335   :  { %v4837_v18 = vpop.eup %4836  ;;  %3608 = vst [vmem:[%s6850_s7 + $0x2d8] sm:$0xff] %v4835_v46  ;;  %v3965_v8 = vpop.f32.mrb[99].mxu0 }
 0x336   :  { %v4839_v26 = vpop.eup %4838  ;;  %3610 = vst [vmem:[%s6850_s7 + $0x2e8] sm:$0xff] %v4837_v18  ;;  %v3966_v29 = vadd.f32 %v3965_v8, %v3964_v31  ;;  %v3246_v0 = vadd.f32 %v3963_v59, %v6622_v38 }
 0x337   :  { %v4841_v6 = vpop.eup %4840  ;;  %3609 = vst [vmem:[%s6850_s7 + $0x2e0] sm:$0xff] %v4839_v26 }
 0x338   :  { %v4843_v13 = vpop.eup %4842  ;;  %3611 = vst [vmem:[%s6850_s7 + $0x2f0] sm:$0xff] %v4841_v6  ;;  %v3249_v20 = vadd.f32 %v3966_v29, %v6622_v38  ;;  %v6634_v29 = vrot.slane %v6330_v63, %v1368_v3 }
 0x339   :  { %v4845_v14 = vpop.eup %4844  ;;  %3615 = vst [vmem:[%s6850_s7 + $0x310] sm:$0xff] %v4843_v13  ;;  %v6631_v13 = vrot.slane %v6330_v63, %v1364_v44 }
 0x33a   :  { %v4847_v32 = vpop.eup %4846  ;;  %3617 = vst [vmem:[%s6850_s7 + $0x320] sm:$0xff] %v4845_v14  ;;  %v3967_v33 = vpop.f32.mrb[100].mxu0 }
 0x33b   :  { %v4849_v16 = vpop.eup %4848  ;;  %3616 = vst [vmem:[%s6850_s7 + $0x318] sm:$0xff] %v4847_v32  ;;  %v3968_v40 = vpop.f32.mrb[101].mxu0 }
 0x33c   :  { %v4851_v17 = vpop.eup %4850  ;;  %3618 = vst [vmem:[%s6850_s7 + $0x328] sm:$0xff] %v4849_v16  ;;  %v3969_v48 = vadd.f32 %v3968_v40, %v3967_v33  ;;  %v3970_v51 = vpop.f32.mrb[102].mxu0 }
 0x33d   :  { %v4853_v21 = vpop.eup %4852  ;;  %3622 = vst [vmem:[%s6850_s7 + $0x348] sm:$0xff] %v4851_v17  ;;  %v3971_v53 = vpop.f32.mrb[103].mxu0 }
 0x33e   :  { %v4855_v47 = vpop.eup %4854  ;;  %3624 = vst [vmem:[%s6850_s7 + $0x358] sm:$0xff] %v4853_v21  ;;  %v3972_v54 = vadd.f32 %v3971_v53, %v3970_v51  ;;  %v3254_v18 = vadd.f32 %v3969_v48, %v6622_v38 }
 0x33f   :  { %v4857_v52 = vpop.eup %4856  ;;  %3623 = vst [vmem:[%s6850_s7 + $0x350] sm:$0xff] %v4855_v47 }
 0x340   :  { %3625 = vst [vmem:[%s6850_s7 + $0x360] sm:$0xff] %v4857_v52  ;;  %v3257_v31 = vadd.f32 %v3972_v54, %v6622_v38 }
 0x342   :  { %v3973_v37 = vpop.f32.mrb[104].mxu0 }
 0x343   :  { %v3974_v56 = vpop.f32.mrb[105].mxu0 }
 0x344   :  { %v3975_v15 = vadd.f32 %v3974_v56, %v3973_v37  ;;  %v3976_v22 = vpop.f32.mrb[106].mxu0 }
 0x345   :  { %v3977_v25 = vpop.f32.mrb[107].mxu0 }
 0x346   :  { %v6606_v27 = vadd.f32 %v3977_v25, %v3976_v22  ;;  %v3262_v63 = vadd.f32 %v3975_v15, %v6622_v38 }
 0x348   :  { %v3265_v22 = vadd.f32 %v6606_v27, %v6622_v38 }
 0x34a   :  { %v3979_v41 = vpop.f32.mrb[108].mxu0 }
 0x34b   :  { %v3980_v42 = vpop.f32.mrb[109].mxu0 }
 0x34c   :  { %v6608_v34 = vadd.f32 %v3980_v42, %v3979_v41  ;;  %v3982_v1 = vpop.f32.mrb[110].mxu0 }
 0x34d   :  { %v3983_v11 = vpop.f32.mrb[111].mxu0 }
 0x34e   :  { %v6610_v62 = vadd.f32 %v3983_v11, %v3982_v1 }
 0x352   :  { %v3985_v45 = vpop.f32.mrb[112].mxu0 }
 0x353   :  { %v3986_v55 = vpop.f32.mrb[113].mxu0 }
 0x354   :  { %v6612_v36 = vadd.f32 %v3986_v55, %v3985_v45  ;;  %v3988_v57 = vpop.f32.mrb[114].mxu0 }
 0x355   :  { %v3989_v7 = vpop.f32.mrb[115].mxu0 }
 0x356   :  { %v6614_v9 = vadd.f32 %v3989_v7, %v3988_v57 }
 0x35a   :  { %v3991_v4 = vpop.f32.mrb[116].mxu0 }
 0x35b   :  { %v3992_v23 = vpop.f32.mrb[117].mxu0 }
 0x35c   :  { %v6617_v43 = vadd.f32 %v3992_v23, %v3991_v4  ;;  %v3994_v61 = vpop.f32.mrb[118].mxu0  ;;  %v3270_v23 = vadd.f32 %v6608_v34, %v6622_v38 }
 0x35d   :  { %v3995_v60 = vpop.f32.mrb[119].mxu0 }
 0x35e   :  { %v6619_v19 = vadd.f32 %v3995_v60, %v3994_v61 }
 0x362   :  { %v4025_v58 = vpop.f32.mrb[120].mxu0 }
 0x363   :  { %v4026_v39 = vpop.f32.mrb[121].mxu0 }
 0x364   :  { %v4027_v49 = vadd.f32 %v4026_v39, %v4025_v58  ;;  %v4028_v50 = vpop.f32.mrb[122].mxu0 }
 0x365   :  { %v4029_v35 = vpop.f32.mrb[123].mxu0 }
 0x366   :  { %v3343_v10 = vadd.f32 %v4027_v49, %v3246_v0  ;;  %v4030_v2 = vadd.f32 %v4029_v35, %v4028_v50  ;;  %v3273_v50 = vadd.f32 %v6610_v62, %v6622_v38 }
 0x368   :  { %4858 = vtanh.f32 %v3343_v10  ;;  %v3346_v12 = vadd.f32 %v4030_v2, %v3249_v20 }
 0x36a   :  { %4860 = vtanh.f32 %v3346_v12  ;;  %v4031_v30 = vpop.f32.mrb[124].mxu0 }
 0x36b   :  { %v4032_v46 = vpop.f32.mrb[125].mxu0 }
 0x36c   :  { %v4033_v5 = vadd.f32 %v4032_v46, %v4031_v30  ;;  %v4034_v26 = vpop.f32.mrb[126].mxu0 }
 0x36d   :  { %v4035_v59 = vpop.f32.mrb[127].mxu0 }
 0x36e   :  { %v3351_v6 = vadd.f32 %v4033_v5, %v3254_v18  ;;  %v4036_v8 = vadd.f32 %v4035_v59, %v4034_v26 }
 0x370   :  { %4862 = vtanh.f32 %v3351_v6  ;;  %v3354_v14 = vadd.f32 %v4036_v8, %v3257_v31  ;;  %v3278_v31 = vadd.f32 %v6612_v36, %v6622_v38 }
 0x371   :  { %v3132_v32 = vpop.f32.mrb[64].mxu1 }
 0x372   :  { %v4859_v16 = vpop.eup %4858  ;;  %4864 = vtanh.f32 %v3354_v14  ;;  %v4153_v28 = vadd.f32 %v3132_v32, %v6631_v13  ;;  %v4037_v17 = vpop.f32.mrb[128].mxu0 }
 0x373   :  { %v3134_v33 = vpop.f32.mrb[65].mxu1  ;;  %3523 = vst [vmem:[%s6850_s7 + $0x30] sm:$0xff] %v4859_v16  ;;  %v4038_v40 = vpop.f32.mrb[129].mxu0 }
 0x374   :  { %v4154_v21 = vadd.f32 %v3134_v33, %v6634_v29  ;;  %v3136_v47 = vpop.f32.mrb[66].mxu1  ;;  %v4861_v48 = vpop.eup %4860  ;;  %4866 = vtanh.f32 %v4153_v28  ;;  %v4039_v51 = vadd.f32 %v4038_v40, %v4037_v17  ;;  %v3281_v33 = vadd.f32 %v6614_v9, %v6622_v38 }
 0x375   :  { %v4155_v52 = vadd.f32 %v3136_v47, %v6631_v13  ;;  %v4040_v53 = vpop.f32.mrb[130].mxu0  ;;  %v3138_v54 = vpop.f32.mrb[67].mxu1  ;;  %3530 = vst [vmem:[%s6850_s7 + $0x68] sm:$0xff] %v4861_v48 }
 0x376   :  { %4868 = vtanh.f32 %v4154_v21  ;;  %v4156_v37 = vadd.f32 %v3138_v54, %v6634_v29  ;;  %v4041_v56 = vpop.f32.mrb[131].mxu0  ;;  %v3359_v25 = vadd.f32 %v4039_v51, %v3262_v63 }
 0x377   :  { %4870 = vtanh.f32 %v4155_v52  ;;  %v4042_v15 = vadd.f32 %v4041_v56, %v4040_v53 }
 0x378   :  { %4872 = vtanh.f32 %v4156_v37 }
 0x379   :  { %4874 = vtanh.f32 %v3359_v25  ;;  %v3362_v41 = vadd.f32 %v4042_v15, %v3265_v22  ;;  %v3142_v42 = vpop.f32.mrb[68].mxu1  ;;  %v3286_v15 = vadd.f32 %v6617_v43, %v6622_v38 }
 0x37a   :  { %v4863_v1 = vpop.eup %4862  ;;  %v4157_v11 = vadd.f32 %v3142_v42, %v6631_v13  ;;  %v4043_v45 = vpop.f32.mrb[132].mxu0 }
 0x37b   :  { %4876 = vtanh.f32 %v3362_v41  ;;  %v3144_v55 = vpop.f32.mrb[69].mxu1  ;;  %3537 = vst [vmem:[%s6850_s7 + $0xa0] sm:$0xff] %v4863_v1  ;;  %v4044_v27 = vpop.f32.mrb[133].mxu0 }
 0x37c   :  { %v4158_v57 = vadd.f32 %v3144_v55, %v6634_v29  ;;  %v3146_v7 = vpop.f32.mrb[70].mxu1  ;;  %v4865_v4 = vpop.eup %4864  ;;  %4878 = vtanh.f32 %v4157_v11  ;;  %v4045_v24 = vadd.f32 %v4044_v27, %v4043_v45  ;;  %v3289_v27 = vadd.f32 %v6619_v19, %v6622_v38 }
 0x37d   :  { %v4159_v61 = vadd.f32 %v3146_v7, %v6631_v13  ;;  %v4046_v60 = vpop.f32.mrb[134].mxu0  ;;  %v3148_v58 = vpop.f32.mrb[71].mxu1  ;;  %3544 = vst [vmem:[%s6850_s7 + $0xd8] sm:$0xff] %v4865_v4 }
 0x37e   :  { %4880 = vtanh.f32 %v4158_v57  ;;  %v4160_v39 = vadd.f32 %v3148_v58, %v6634_v29  ;;  %v4047_v0 = vpop.f32.mrb[135].mxu0  ;;  %v4867_v49 = vpop.eup %4866  ;;  %v3367_v35 = vadd.f32 %v4045_v24, %v3270_v23 }
 0x37f   :  { %4882 = vtanh.f32 %v4159_v61  ;;  %v4048_v34 = vadd.f32 %v4047_v0, %v4046_v60  ;;  %3521 = vst [vmem:[%s6850_s7 + $0x20] sm:$0xff] %v4867_v49 }
 0x380   :  { %v4869_v20 = vpop.eup %4868  ;;  %4884 = vtanh.f32 %v4160_v39 }
 0x381   :  { %v4871_v10 = vpop.eup %4870  ;;  %3522 = vst [vmem:[%s6850_s7 + $0x28] sm:$0xff] %v4869_v20  ;;  %4886 = vtanh.f32 %v3367_v35  ;;  %v3370_v2 = vadd.f32 %v4048_v34, %v3273_v50  ;;  %v3152_v62 = vpop.f32.mrb[72].mxu1 }
 0x382   :  { %v4873_v12 = vpop.eup %4872  ;;  %3528 = vst [vmem:[%s6850_s7 + $0x58] sm:$0xff] %v4871_v10  ;;  %v4161_v44 = vadd.f32 %v3152_v62, %v6631_v13  ;;  %v4049_v46 = vpop.f32.mrb[136].mxu0 }
 0x383   :  { %v4875_v30 = vpop.eup %4874  ;;  %3529 = vst [vmem:[%s6850_s7 + $0x60] sm:$0xff] %v4873_v12  ;;  %4888 = vtanh.f32 %v3370_v2  ;;  %v3154_v3 = vpop.f32.mrb[73].mxu1 }
 0x384   :  { %3551 = vst [vmem:[%s6850_s7 + $0x110] sm:$0xff] %v4875_v30  ;;  %v4162_v18 = vadd.f32 %v3154_v3, %v6634_v29  ;;  %v4050_v5 = vpop.f32.mrb[137].mxu0  ;;  %v3156_v26 = vpop.f32.mrb[74].mxu1  ;;  %4890 = vtanh.f32 %v4161_v44 }
 0x385   :  { %v4877_v59 = vpop.eup %4876  ;;  %v4051_v6 = vadd.f32 %v4050_v5, %v4049_v46  ;;  %v4163_v8 = vadd.f32 %v3156_v26, %v6631_v13  ;;  %v4052_v14 = vpop.f32.mrb[138].mxu0 }
 0x386   :  { %v3158_v32 = vpop.f32.mrb[75].mxu1  ;;  %3558 = vst [vmem:[%s6850_s7 + $0x148] sm:$0xff] %v4877_v59  ;;  %4892 = vtanh.f32 %v4162_v18  ;;  %v4053_v28 = vpop.f32.mrb[139].mxu0 }
 0x387   :  { %v4164_v16 = vadd.f32 %v3158_v32, %v6634_v29  ;;  %v4879_v17 = vpop.eup %4878  ;;  %v3375_v21 = vadd.f32 %v4051_v6, %v3278_v31  ;;  %4894 = vtanh.f32 %v4163_v8  ;;  %v4054_v36 = vadd.f32 %v4053_v28, %v4052_v14 }
 0x388   :  { %v4881_v40 = vpop.eup %4880  ;;  %3535 = vst [vmem:[%s6850_s7 + $0x90] sm:$0xff] %v4879_v17 }
 0x389   :  { %4896 = vtanh.f32 %v4164_v16  ;;  %v4883_v47 = vpop.eup %4882  ;;  %3536 = vst [vmem:[%s6850_s7 + $0x98] sm:$0xff] %v4881_v40  ;;  %v3378_v48 = vadd.f32 %v4054_v36, %v3281_v33  ;;  %v3162_v9 = vpop.f32.mrb[76].mxu1 }
 0x38a   :  { %4898 = vtanh.f32 %v3375_v21  ;;  %v4885_v63 = vpop.eup %4884  ;;  %3542 = vst [vmem:[%s6850_s7 + $0xc8] sm:$0xff] %v4883_v47  ;;  %v4165_v52 = vadd.f32 %v3162_v9, %v6631_v13  ;;  %v4055_v53 = vpop.f32.mrb[140].mxu0 }
 0x38b   :  { %v4887_v51 = vpop.eup %4886  ;;  %3543 = vst [vmem:[%s6850_s7 + $0xd0] sm:$0xff] %v4885_v63  ;;  %4900 = vtanh.f32 %v3378_v48  ;;  %v3164_v54 = vpop.f32.mrb[77].mxu1 }
 0x38c   :  { %3565 = vst [vmem:[%s6850_s7 + $0x180] sm:$0xff] %v4887_v51  ;;  %v4166_v37 = vadd.f32 %v3164_v54, %v6634_v29  ;;  %v4056_v56 = vpop.f32.mrb[141].mxu0  ;;  %v3166_v22 = vpop.f32.mrb[78].mxu1  ;;  %4902 = vtanh.f32 %v4165_v52 }
 0x38d   :  { %v4889_v25 = vpop.eup %4888  ;;  %v4057_v41 = vadd.f32 %v4056_v56, %v4055_v53  ;;  %v4167_v42 = vadd.f32 %v3166_v22, %v6631_v13  ;;  %v4058_v1 = vpop.f32.mrb[142].mxu0 }
 0x38e   :  { %v3168_v11 = vpop.f32.mrb[79].mxu1  ;;  %3572 = vst [vmem:[%s6850_s7 + $0x1b8] sm:$0xff] %v4889_v25  ;;  %4904 = vtanh.f32 %v4166_v37  ;;  %v4059_v55 = vpop.f32.mrb[143].mxu0 }
 0x38f   :  { %v4168_v45 = vadd.f32 %v3168_v11, %v6634_v29  ;;  %v4891_v57 = vpop.eup %4890  ;;  %v3383_v7 = vadd.f32 %v4057_v41, %v3286_v15  ;;  %4906 = vtanh.f32 %v4167_v42  ;;  %v4060_v43 = vadd.f32 %v4059_v55, %v4058_v1 }
 0x390   :  { %v4893_v4 = vpop.eup %4892  ;;  %3549 = vst [vmem:[%s6850_s7 + $0x100] sm:$0xff] %v4891_v57 }
 0x391   :  { %4908 = vtanh.f32 %v4168_v45  ;;  %v4895_v23 = vpop.eup %4894  ;;  %3550 = vst [vmem:[%s6850_s7 + $0x108] sm:$0xff] %v4893_v4  ;;  %v3386_v24 = vadd.f32 %v4060_v43, %v3289_v27  ;;  %v3172_v19 = vpop.f32.mrb[80].mxu1 }
 0x392   :  { %4910 = vtanh.f32 %v3383_v7  ;;  %3556 = vst [vmem:[%s6850_s7 + $0x138] sm:$0xff] %v4895_v23  ;;  %v4169_v58 = vadd.f32 %v3172_v19, %v6631_v13  ;;  %v4061_v39 = vpop.f32.mrb[144].mxu0  ;;  %v3174_v0 = vpop.f32.mrb[81].mxu1 }
 0x393   :  { %v4897_v61 = vpop.eup %4896  ;;  %4912 = vtanh.f32 %v3386_v24  ;;  %v4170_v49 = vadd.f32 %v3174_v0, %v6634_v29  ;;  %v4062_v50 = vpop.f32.mrb[145].mxu0 }
 0x394   :  { %v4899_v60 = vpop.eup %4898  ;;  %3557 = vst [vmem:[%s6850_s7 + $0x140] sm:$0xff] %v4897_v61  ;;  %v3176_v35 = vpop.f32.mrb[82].mxu1  ;;  %4914 = vtanh.f32 %v4169_v58  ;;  %v6732_v20 = vadd.f32 %v4062_v50, %v4061_v39 }
 0x395   :  { %3579 = vst [vmem:[%s6850_s7 + $0x1f0] sm:$0xff] %v4899_v60  ;;  %v4901_v34 = vpop.eup %4900  ;;  %v4171_v10 = vadd.f32 %v3176_v35, %v6631_v13  ;;  %v4064_v2 = vpop.f32.mrb[146].mxu0  ;;  %4916 = vtanh.f32 %v4170_v49 }
 0x396   :  { %v3178_v12 = vpop.f32.mrb[83].mxu1  ;;  %3586 = vst [vmem:[%s6850_s7 + $0x228] sm:$0xff] %v4901_v34  ;;  %v4065_v30 = vpop.f32.mrb[147].mxu0 }
 0x397   :  { %v4172_v62 = vadd.f32 %v3178_v12, %v6634_v29  ;;  %v4903_v44 = vpop.eup %4902  ;;  %4918 = vtanh.f32 %v4171_v10  ;;  %v6739_v46 = vadd.f32 %v4065_v30, %v4064_v2 }
 0x398   :  { %v4905_v3 = vpop.eup %4904  ;;  %3563 = vst [vmem:[%s6850_s7 + $0x170] sm:$0xff] %v4903_v44 }
 0x399   :  { %4920 = vtanh.f32 %v4172_v62  ;;  %v4907_v18 = vpop.eup %4906  ;;  %3564 = vst [vmem:[%s6850_s7 + $0x178] sm:$0xff] %v4905_v3  ;;  %v3182_v26 = vpop.f32.mrb[84].mxu1 }
 0x39a   :  { %3570 = vst [vmem:[%s6850_s7 + $0x1a8] sm:$0xff] %v4907_v18  ;;  %v4173_v31 = vadd.f32 %v3182_v26, %v6631_v13  ;;  %v4067_v6 = vpop.f32.mrb[148].mxu0  ;;  %v3184_v8 = vpop.f32.mrb[85].mxu1 }
 0x39b   :  { %v4909_v5 = vpop.eup %4908  ;;  %v4174_v14 = vadd.f32 %v3184_v8, %v6634_v29  ;;  %v4068_v32 = vpop.f32.mrb[149].mxu0 }
 0x39c   :  { %v4911_v59 = vpop.eup %4910  ;;  %3571 = vst [vmem:[%s6850_s7 + $0x1b0] sm:$0xff] %v4909_v5  ;;  %v3186_v16 = vpop.f32.mrb[86].mxu1  ;;  %4922 = vtanh.f32 %v4173_v31  ;;  %v6758_v17 = vadd.f32 %v4068_v32, %v4067_v6 }
 0x39d   :  { %3593 = vst [vmem:[%s6850_s7 + $0x260] sm:$0xff] %v4911_v59  ;;  %v4913_v28 = vpop.eup %4912  ;;  %v4175_v33 = vadd.f32 %v3186_v16, %v6631_v13  ;;  %v4070_v21 = vpop.f32.mrb[150].mxu0  ;;  %4924 = vtanh.f32 %v4174_v14 }
 0x39e   :  { %v3188_v36 = vpop.f32.mrb[87].mxu1  ;;  %3600 = vst [vmem:[%s6850_s7 + $0x298] sm:$0xff] %v4913_v28  ;;  %v4071_v47 = vpop.f32.mrb[151].mxu0 }
 0x39f   :  { %v4176_v40 = vadd.f32 %v3188_v36, %v6634_v29  ;;  %v4915_v48 = vpop.eup %4914  ;;  %4926 = vtanh.f32 %v4175_v33  ;;  %v6765_v63 = vadd.f32 %v4071_v47, %v4070_v21 }
 0x3a0   :  { %v4917_v9 = vpop.eup %4916  ;;  %3577 = vst [vmem:[%s6850_s7 + $0x1e0] sm:$0xff] %v4915_v48 }
 0x3a1   :  { %4928 = vtanh.f32 %v4176_v40  ;;  %v4919_v51 = vpop.eup %4918  ;;  %3578 = vst [vmem:[%s6850_s7 + $0x1e8] sm:$0xff] %v4917_v9  ;;  %v3192_v53 = vpop.f32.mrb[88].mxu1 }
 0x3a2   :  { %3584 = vst [vmem:[%s6850_s7 + $0x218] sm:$0xff] %v4919_v51  ;;  %v4177_v54 = vadd.f32 %v3192_v53, %v6631_v13  ;;  %v3194_v37 = vpop.f32.mrb[89].mxu1 }
 0x3a3   :  { %v4921_v52 = vpop.eup %4920  ;;  %v4178_v56 = vadd.f32 %v3194_v37, %v6634_v29  ;;  %v3196_v22 = vpop.f32.mrb[90].mxu1 }
 0x3a4   :  { %3585 = vst [vmem:[%s6850_s7 + $0x220] sm:$0xff] %v4921_v52  ;;  %4930 = vtanh.f32 %v4177_v54  ;;  %v4179_v25 = vadd.f32 %v3196_v22, %v6631_v13  ;;  %v3198_v15 = vpop.f32.mrb[91].mxu1 }
 0x3a5   :  { %4932 = vtanh.f32 %v4178_v56  ;;  %v4180_v41 = vadd.f32 %v3198_v15, %v6634_v29 }
 0x3a6   :  { %v4923_v42 = vpop.eup %4922  ;;  %4934 = vtanh.f32 %v4179_v25 }
 0x3a7   :  { %v4925_v1 = vpop.eup %4924  ;;  %3591 = vst [vmem:[%s6850_s7 + $0x250] sm:$0xff] %v4923_v42  ;;  %4936 = vtanh.f32 %v4180_v41 }
 0x3a8   :  { %3592 = vst [vmem:[%s6850_s7 + $0x258] sm:$0xff] %v4925_v1 }
 0x3a9   :  { %v4927_v11 = vpop.eup %4926  ;;  %v3202_v55 = vpop.f32.mrb[92].mxu1 }
 0x3aa   :  { %3598 = vst [vmem:[%s6850_s7 + $0x288] sm:$0xff] %v4927_v11  ;;  %v4181_v57 = vadd.f32 %v3202_v55, %v6631_v13  ;;  %v3204_v27 = vpop.f32.mrb[93].mxu1 }
 0x3ab   :  { %v4929_v45 = vpop.eup %4928  ;;  %v4182_v7 = vadd.f32 %v3204_v27, %v6634_v29  ;;  %v3206_v43 = vpop.f32.mrb[94].mxu1 }
 0x3ac   :  { %3599 = vst [vmem:[%s6850_s7 + $0x290] sm:$0xff] %v4929_v45  ;;  %4938 = vtanh.f32 %v4181_v57  ;;  %v4183_v4 = vadd.f32 %v3206_v43, %v6631_v13  ;;  %v3208_v23 = vpop.f32.mrb[95].mxu1 }
 0x3ad   :  { %4940 = vtanh.f32 %v4182_v7  ;;  %v4184_v24 = vadd.f32 %v3208_v23, %v6634_v29 }
 0x3ae   :  { %v4931_v61 = vpop.eup %4930  ;;  %4942 = vtanh.f32 %v4183_v4 }
 0x3af   :  { %v4933_v19 = vpop.eup %4932  ;;  %3605 = vst [vmem:[%s6850_s7 + $0x2c0] sm:$0xff] %v4931_v61  ;;  %4944 = vtanh.f32 %v4184_v24 }
 0x3b0   :  { %v4935_v60 = vpop.eup %4934  ;;  %3606 = vst [vmem:[%s6850_s7 + $0x2c8] sm:$0xff] %v4933_v19 }
 0x3b1   :  { %v4937_v58 = vpop.eup %4936  ;;  %3612 = vst [vmem:[%s6850_s7 + $0x2f8] sm:$0xff] %v4935_v60  ;;  %v3997_v13 = vpop.f32.mrb[96].mxu1 }
 0x3b2   :  { %3613 = vst [vmem:[%s6850_s7 + $0x300] sm:$0xff] %v4937_v58  ;;  %v3998_v29 = vpop.f32.mrb[97].mxu1 }
 0x3b3   :  { %v3999_v39 = vadd.f32 %v3998_v29, %v3997_v13  ;;  %v4000_v0 = vpop.f32.mrb[98].mxu1 }
 0x3b4   :  { %v4001_v49 = vpop.f32.mrb[99].mxu1 }
 0x3b5   :  { %v3294_v50 = vadd.f32 %v3999_v39, %v6622_v38  ;;  %v4002_v35 = vadd.f32 %v4001_v49, %v4000_v0 }
 0x3b6   :  { %v4939_v34 = vpop.eup %4938 }
 0x3b7   :  { %v4941_v10 = vpop.eup %4940  ;;  %3619 = vst [vmem:[%s6850_s7 + $0x330] sm:$0xff] %v4939_v34  ;;  %v3391_v2 = vadd.f32 %v6732_v20, %v3294_v50  ;;  %v3297_v12 = vadd.f32 %v4002_v35, %v6622_v38 }
 0x3b8   :  { %v4943_v62 = vpop.eup %4942  ;;  %3620 = vst [vmem:[%s6850_s7 + $0x338] sm:$0xff] %v4941_v10 }
 0x3b9   :  { %v4945_v30 = vpop.eup %4944  ;;  %3626 = vst [vmem:[%s6850_s7 + $0x368] sm:$0xff] %v4943_v62  ;;  %4946 = vtanh.f32 %v3391_v2  ;;  %v3394_v44 = vadd.f32 %v6739_v46, %v3297_v12  ;;  %v4003_v3 = vpop.f32.mrb[100].mxu1 }
 0x3ba   :  { %3627 = vst [vmem:[%s6850_s7 + $0x370] sm:$0xff] %v4945_v30  ;;  %v4004_v20 = vpop.f32.mrb[101].mxu1 }
 0x3bb   :  { %4948 = vtanh.f32 %v3394_v44  ;;  %v4005_v18 = vadd.f32 %v4004_v20, %v4003_v3  ;;  %v4006_v5 = vpop.f32.mrb[102].mxu1 }
 0x3bc   :  { %v4007_v26 = vpop.f32.mrb[103].mxu1 }
 0x3bd   :  { %v3302_v59 = vadd.f32 %v4005_v18, %v6622_v38  ;;  %v4008_v31 = vadd.f32 %v4007_v26, %v4006_v5 }
 0x3bf   :  { %v3399_v6 = vadd.f32 %v6758_v17, %v3302_v59  ;;  %v3305_v8 = vadd.f32 %v4008_v31, %v6622_v38 }
 0x3c1   :  { %4950 = vtanh.f32 %v3399_v6  ;;  %v3402_v46 = vadd.f32 %v6765_v63, %v3305_v8 }
 0x3c3   :  { %v4947_v14 = vpop.eup %4946  ;;  %4952 = vtanh.f32 %v3402_v46 }
 0x3c4   :  { %3607 = vst [vmem:[%s6850_s7 + $0x2d0] sm:$0xff] %v4947_v14 }
 0x3c5   :  { %v4949_v32 = vpop.eup %4948 }
 0x3c6   :  { %3614 = vst [vmem:[%s6850_s7 + $0x308] sm:$0xff] %v4949_v32 }
 0x3cb   :  { %v4951_v16 = vpop.eup %4950 }
 0x3cc   :  { %3621 = vst [vmem:[%s6850_s7 + $0x340] sm:$0xff] %v4951_v16 }
 0x3cd   :  { %v4953_v38 = vpop.eup %4952 }
 0x3ce   :  { %3628 = vst [vmem:[%s6850_s7 + $0x378] sm:$0xff] %v4953_v38 }

</bundles_post_ra>
